<compile_context>
chip_gen: v7x
topology: tpu7x:2x2x1
jax: 0.10.0
libtpu: 0.0.40
codegen_flags: <defaults>
</compile_context>

<pallas_src>
import functools

import jax
import jax.numpy as jnp
from jax.experimental import pallas as pl
from jax.experimental.pallas import tpu as pltpu


# -----------------------------------------------------------------------------
# Pallas kernel: one grid step == one image. conv (im2col matmul) + BN + ReLU.
# -----------------------------------------------------------------------------
def _conv_bn_relu_kernel(xpad_ref, w_ref, scale_ref, shift_ref, out_ref, *,
                         Cin, Cout, KH, KW, DH, DW, Ho, Wo):
    xp = xpad_ref[0]  # (H+2*PH, W+2*PW, Cin) bf16, zero-padded input for this image

    # --- im2col: build (Ho*Wo, KH*KW*Cin) patch matrix, then ONE wide-K matmul ---
    taps = []
    for ky in range(KH):
        for kx in range(KW):
            taps.append(
                xp[ky * DH:ky * DH + Ho, kx * DW:kx * DW + Wo, :].reshape(Ho * Wo, Cin))
    patches = taps[0] if len(taps) == 1 else jnp.concatenate(taps, axis=-1)

    acc = jnp.dot(patches, w_ref[...],
                  preferred_element_type=jnp.float32)          # (Ho*Wo, Cout) f32

    # --- BatchNorm (inference, folded; conv bias folded into shift) + ReLU ---
    y = jnp.maximum(acc * scale_ref[...] + shift_ref[...], 0.0)

    # Lane-dense store: Cout sits in the lane dim of the output block.
    out_ref[0] = y.reshape(Ho, Wo, Cout).astype(out_ref.dtype)


# -----------------------------------------------------------------------------
# Public wrapper: NCHW in / NCHW out, PyTorch-style parameters.
# -----------------------------------------------------------------------------
def conv2d_batchnorm_relu(x_nchw, params, *, stride=1, padding=1, dilation=1,
                          eps=1e-5):
    """x_nchw: (N, Cin, H, W) f32 -> (N, Cout, Ho, Wo) f32."""
    # TODO(synk): stride > 1 not implemented (strided value slices); PSPNet's
    #             cbr blocks exercised here use stride=1.
    assert stride == 1, "only stride=1 is implemented"
    # TODO(synk): 'pp-pad' / 'partial' padding modes depend on external modules;
    #             only 'zeros' padding is implemented.
    # TODO(synk): training-mode BatchNorm2d (batch statistics + running-stat
    #             updates) not implemented; eval-mode folding only.

    w_oihw = params["conv_w"]                     # (Cout, Cin, KH, KW)  PyTorch OIHW
    Cout, Cin, KH, KW = w_oihw.shape
    N, Cin_x, H, W = x_nchw.shape
    assert Cin_x == Cin
    PH = PW = int(padding)
    DH = DW = int(dilation)
    Ho = H + 2 * PH - DH * (KH - 1)
    Wo = W + 2 * PW - DW * (KW - 1)
    assert Ho > 0 and Wo > 0

    # Fold BN (inference stats) and the optional conv bias into one affine.
    scale = params["bn_gamma"] / jnp.sqrt(params["bn_var"] + eps)      # (Cout,)
    shift = params["bn_beta"] - params["bn_mean"] * scale              # (Cout,)
    bias = params.get("conv_b", None)
    if bias is not None:
        shift = shift + bias * scale
    scale = scale[None, :].astype(jnp.float32)
    shift = shift[None, :].astype(jnp.float32)

    # OIHW -> (KH*KW*Cin, Cout) bf16, row order (ky, kx, c) matching the in-kernel im2col.
    w_mat = jnp.transpose(w_oihw, (2, 3, 1, 0)).reshape(KH * KW * Cin, Cout)
    w_mat = w_mat.astype(jnp.bfloat16)

    # NCHW -> NHWC, bf16 activations (halves HBM DMA bytes), zero halo for the conv.
    x = jnp.transpose(x_nchw, (0, 2, 3, 1)).astype(jnp.bfloat16)
    xpad = jnp.pad(x, ((0, 0), (PH, PH), (PW, PW), (0, 0)))

    kernel = functools.partial(_conv_bn_relu_kernel, Cin=Cin, Cout=Cout,
                               KH=KH, KW=KW, DH=DH, DW=DW, Ho=Ho, Wo=Wo)

    flops = 2 * N * Ho * Wo * KH * KW * Cin * Cout + 3 * N * Ho * Wo * Cout
    bytes_accessed = (xpad.size * 2 + w_mat.size * 2
                      + (scale.size + shift.size) * 4
                      + N * Ho * Wo * Cout * 4)

    out_nhwc = pl.pallas_call(
        kernel,
        out_shape=jax.ShapeDtypeStruct((N, Ho, Wo, Cout), jnp.float32),
        grid_spec=pltpu.PrefetchScalarGridSpec(
            num_scalar_prefetch=0,
            grid=(N,),
            in_specs=[
                pl.BlockSpec((1, H + 2 * PH, W + 2 * PW, Cin),
                             lambda n: (n, 0, 0, 0)),
                # Constant index maps: weights / scale / shift stay VMEM-resident
                # across grid steps (no per-image re-DMA).
                pl.BlockSpec((KH * KW * Cin, Cout), lambda n: (0, 0)),
                pl.BlockSpec((1, Cout), lambda n: (0, 0)),
                pl.BlockSpec((1, Cout), lambda n: (0, 0)),
            ],
            out_specs=pl.BlockSpec((1, Ho, Wo, Cout), lambda n: (n, 0, 0, 0)),
        ),
        compiler_params=pltpu.CompilerParams(
            dimension_semantics=("parallel",),
            vmem_limit_bytes=32 * 1024 * 1024),
        cost_estimate=pl.CostEstimate(flops=flops, transcendentals=0,
                                      bytes_accessed=bytes_accessed),
    )(xpad, w_mat, scale, shift)

    return jnp.transpose(out_nhwc, (0, 3, 1, 2))  # NHWC -> NCHW (PyTorch layout)


# -----------------------------------------------------------------------------
# Pure-JAX reference (same bf16 input quantization, f32 math) for a sanity check.
# -----------------------------------------------------------------------------
def _reference(x_nchw, params, *, stride=1, padding=1, dilation=1, eps=1e-5):
    p = int(padding)
    d = int(dilation)
    xq = x_nchw.astype(jnp.bfloat16).astype(jnp.float32)
    wq = params["conv_w"].astype(jnp.bfloat16).astype(jnp.float32)
    y = jax.lax.conv_general_dilated(
        xq, wq, window_strides=(stride, stride), padding=((p, p), (p, p)),
        rhs_dilation=(d, d), dimension_numbers=("NCHW", "OIHW", "NCHW"),
        precision=jax.lax.Precision.HIGHEST)
    scale = params["bn_gamma"] / jnp.sqrt(params["bn_var"] + eps)
    shift = params["bn_beta"] - params["bn_mean"] * scale
    if params.get("conv_b", None) is not None:
        shift = shift + params["conv_b"] * scale
    y = y * scale[None, :, None, None] + shift[None, :, None, None]
    return jnp.maximum(y, 0.0)


if __name__ == "__main__":
    # Small shapes consistent with the module (conv3x3, stride 1, zero padding).
    N, Cin, H, W = 2, 4, 16, 16
    Cout = 128   # nn.Conv2d out_channels; a multiple of 128 keeps output stores lane-dense

    key = jax.random.PRNGKey(0)
    ks = jax.random.split(key, 8)
    params = {
        "conv_w": 0.1 * jax.random.normal(ks[0], (Cout, Cin, 3, 3), jnp.float32),
        "conv_b": None,                                    # bias=False config
        "bn_gamma": 1.0 + 0.1 * jax.random.normal(ks[1], (Cout,), jnp.float32),
        "bn_beta": 0.1 * jax.random.normal(ks[2], (Cout,), jnp.float32),
        "bn_mean": 0.05 * jax.random.normal(ks[3], (Cout,), jnp.float32),
        "bn_var": 1.0 + 0.1 * jnp.abs(jax.random.normal(ks[4], (Cout,), jnp.float32)),
    }
    x = jax.random.normal(ks[5], (N, Cin, H, W), jnp.float32)

    # Config A: conv3x3, stride 1, pad 1, dilation 1, bias=False (typical PSPNet cbr).
    out = jax.block_until_ready(conv2d_batchnorm_relu(x, params, padding=1, dilation=1))
    assert out.shape == (N, Cout, H, W), out.shape
    assert bool(jnp.all(jnp.isfinite(out)))
    ref = jax.block_until_ready(_reference(x, params, padding=1, dilation=1))
    assert bool(jnp.allclose(out, ref, atol=2e-3, rtol=2e-3)), float(
        jnp.max(jnp.abs(out - ref)))

    # Config B: conv3x3, pad 2, dilation 2, bias=True (exercises dilation + bias folding).
    params_b = dict(params)
    params_b["conv_b"] = 0.05 * jax.random.normal(ks[6], (Cout,), jnp.float32)
    out_b = jax.block_until_ready(conv2d_batchnorm_relu(x, params_b, padding=2, dilation=2))
    assert out_b.shape == (N, Cout, H, W), out_b.shape
    ref_b = jax.block_until_ready(_reference(x, params_b, padding=2, dilation=2))
    assert bool(jnp.allclose(out_b, ref_b, atol=2e-3, rtol=2e-3)), float(
        jnp.max(jnp.abs(out_b - ref_b)))

    print("KERNEL_OK")
</pallas_src>

<mosaic_0001>
module attributes {stable_mosaic.version = 11 : i64} {
  func.func @_conv_bn_relu_kernel(%arg0: i32, %arg1: memref<1x18x18x4xbf16, #tpu.memory_space<vmem>>, %arg2: memref<36x128xbf16, #tpu.memory_space<vmem>>, %arg3: memref<1x128xf32, #tpu.memory_space<vmem>>, %arg4: memref<1x128xf32, #tpu.memory_space<vmem>>, %arg5: memref<1x16x16x128xf32, #tpu.memory_space<vmem>>) attributes {dimension_semantics = [#tpu.dimension_semantics<parallel>], iteration_bounds = array<i64: 2>, scalar_prefetch = 0 : i64, scratch_operands = 0 : i64, tpu.core_type = #tpu.core_type<tc>, window_params = [{transform_indices = @transform_0, window_bounds = array<i64: 1, 18, 18, 4>}, {pipeline_mode = #tpu.pipeline_mode<synchronous>, transform_indices = @transform_1, window_bounds = array<i64: 36, 128>}, {pipeline_mode = #tpu.pipeline_mode<synchronous>, transform_indices = @transform_2, window_bounds = array<i64: 1, 128>}, {pipeline_mode = #tpu.pipeline_mode<synchronous>, transform_indices = @transform_3, window_bounds = array<i64: 1, 128>}, {transform_indices = @transform_4, window_bounds = array<i64: 1, 16, 16, 128>}]} {
    %c0 = arith.constant 0 : index
    %c0_0 = arith.constant 0 : index
    %c0_1 = arith.constant 0 : index
    %c0_2 = arith.constant 0 : index
    %0 = vector.load %arg1[%c0, %c0_0, %c0_1, %c0_2] : memref<1x18x18x4xbf16, #tpu.memory_space<vmem>>, vector<1x18x18x4xbf16>
    %1 = vector.shape_cast %0 : vector<1x18x18x4xbf16> to vector<18x18x4xbf16>
    %2 = vector.extract_strided_slice %1 {offsets = [0, 0, 0], sizes = [16, 16, 4], strides = [1, 1, 1]} : vector<18x18x4xbf16> to vector<16x16x4xbf16>
    %3 = vector.shape_cast %2 : vector<16x16x4xbf16> to vector<256x4xbf16>
    %4 = vector.extract_strided_slice %1 {offsets = [0, 1, 0], sizes = [16, 16, 4], strides = [1, 1, 1]} : vector<18x18x4xbf16> to vector<16x16x4xbf16>
    %5 = vector.shape_cast %4 : vector<16x16x4xbf16> to vector<256x4xbf16>
    %6 = vector.extract_strided_slice %1 {offsets = [0, 2, 0], sizes = [16, 16, 4], strides = [1, 1, 1]} : vector<18x18x4xbf16> to vector<16x16x4xbf16>
    %7 = vector.shape_cast %6 : vector<16x16x4xbf16> to vector<256x4xbf16>
    %8 = vector.extract_strided_slice %1 {offsets = [1, 0, 0], sizes = [16, 16, 4], strides = [1, 1, 1]} : vector<18x18x4xbf16> to vector<16x16x4xbf16>
    %9 = vector.shape_cast %8 : vector<16x16x4xbf16> to vector<256x4xbf16>
    %10 = vector.extract_strided_slice %1 {offsets = [1, 1, 0], sizes = [16, 16, 4], strides = [1, 1, 1]} : vector<18x18x4xbf16> to vector<16x16x4xbf16>
    %11 = vector.shape_cast %10 : vector<16x16x4xbf16> to vector<256x4xbf16>
    %12 = vector.extract_strided_slice %1 {offsets = [1, 2, 0], sizes = [16, 16, 4], strides = [1, 1, 1]} : vector<18x18x4xbf16> to vector<16x16x4xbf16>
    %13 = vector.shape_cast %12 : vector<16x16x4xbf16> to vector<256x4xbf16>
    %14 = vector.extract_strided_slice %1 {offsets = [2, 0, 0], sizes = [16, 16, 4], strides = [1, 1, 1]} : vector<18x18x4xbf16> to vector<16x16x4xbf16>
    %15 = vector.shape_cast %14 : vector<16x16x4xbf16> to vector<256x4xbf16>
    %16 = vector.extract_strided_slice %1 {offsets = [2, 1, 0], sizes = [16, 16, 4], strides = [1, 1, 1]} : vector<18x18x4xbf16> to vector<16x16x4xbf16>
    %17 = vector.shape_cast %16 : vector<16x16x4xbf16> to vector<256x4xbf16>
    %18 = vector.extract_strided_slice %1 {offsets = [2, 2, 0], sizes = [16, 16, 4], strides = [1, 1, 1]} : vector<18x18x4xbf16> to vector<16x16x4xbf16>
    %19 = vector.shape_cast %18 : vector<16x16x4xbf16> to vector<256x4xbf16>
    %20 = tpu.concatenate %3, %5, %7, %9, %11, %13, %15, %17, %19 in 1 : vector<256x4xbf16>, vector<256x4xbf16>, vector<256x4xbf16>, vector<256x4xbf16>, vector<256x4xbf16>, vector<256x4xbf16>, vector<256x4xbf16>, vector<256x4xbf16>, vector<256x4xbf16> -> vector<256x36xbf16>
    %c0_3 = arith.constant 0 : index
    %c0_4 = arith.constant 0 : index
    %21 = vector.load %arg2[%c0_3, %c0_4] : memref<36x128xbf16, #tpu.memory_space<vmem>>, vector<36x128xbf16>
    %cst = arith.constant dense<0.000000e+00> : vector<256x128xf32>
    %22 = tpu.matmul %20, %21, %cst {dimension_numbers = #tpu.dot_dimension_numbers<[1], [0], [0], [1], [0, 0, 1, 1], [], []>} : vector<256x36xbf16>, vector<36x128xbf16>, vector<256x128xf32> -> vector<256x128xf32>
    %c0_5 = arith.constant 0 : index
    %c0_6 = arith.constant 0 : index
    %23 = vector.load %arg3[%c0_5, %c0_6] : memref<1x128xf32, #tpu.memory_space<vmem>>, vector<1x128xf32>
    %24 = vector.broadcast %23 : vector<1x128xf32> to vector<256x128xf32>
    %25 = arith.mulf %22, %24 : vector<256x128xf32>
    %c0_7 = arith.constant 0 : index
    %c0_8 = arith.constant 0 : index
    %26 = vector.load %arg4[%c0_7, %c0_8] : memref<1x128xf32, #tpu.memory_space<vmem>>, vector<1x128xf32>
    %27 = vector.broadcast %26 : vector<1x128xf32> to vector<256x128xf32>
    %28 = arith.addf %25, %27 : vector<256x128xf32>
    %cst_9 = arith.constant 0.000000e+00 : f32
    %29 = vector.broadcast %cst_9 : f32 to vector<256x128xf32>
    %30 = arith.maximumf %28, %29 : vector<256x128xf32>
    %31 = vector.shape_cast %30 : vector<256x128xf32> to vector<16x16x128xf32>
    %c0_10 = arith.constant 0 : index
    %c0_11 = arith.constant 0 : index
    %c0_12 = arith.constant 0 : index
    %c0_13 = arith.constant 0 : index
    %32 = vector.load %arg5[%c0_10, %c0_11, %c0_12, %c0_13] : memref<1x16x16x128xf32, #tpu.memory_space<vmem>>, vector<1x16x16x128xf32>
    %33 = vector.shape_cast %32 : vector<1x16x16x128xf32> to vector<16x16x128xf32>
    %34 = vector.shape_cast %31 : vector<16x16x128xf32> to vector<1x16x16x128xf32>
    tpu.vector_store %arg5[%c0_10, %c0_11, %c0_12, %c0_13], %34 {strides = array<i32>} : memref<1x16x16x128xf32, #tpu.memory_space<vmem>>, vector<1x16x16x128xf32>,
    return
  }
  func.func @transform_0(%arg0: i32) -> (i32, i32, i32, i32) {
    %c0_i32 = arith.constant 0 : i32
    %c0_i32_0 = arith.constant 0 : i32
    %c0_i32_1 = arith.constant 0 : i32
    %c0_i32_2 = arith.constant 0 : i32
    return %arg0, %c0_i32, %c0_i32_0, %c0_i32_1 : i32, i32, i32, i32
  }
  func.func @transform_1(%arg0: i32) -> (i32, i32) {
    %c0_i32 = arith.constant 0 : i32
    %c0_i32_0 = arith.constant 0 : i32
    %c0_i32_1 = arith.constant 0 : i32
    return %c0_i32, %c0_i32_0 : i32, i32
  }
  func.func @transform_2(%arg0: i32) -> (i32, i32) {
    %c0_i32 = arith.constant 0 : i32
    %c0_i32_0 = arith.constant 0 : i32
    %c0_i32_1 = arith.constant 0 : i32
    return %c0_i32, %c0_i32_0 : i32, i32
  }
  func.func @transform_3(%arg0: i32) -> (i32, i32) {
    %c0_i32 = arith.constant 0 : i32
    %c0_i32_0 = arith.constant 0 : i32
    %c0_i32_1 = arith.constant 0 : i32
    return %c0_i32, %c0_i32_0 : i32, i32
  }
  func.func @transform_4(%arg0: i32) -> (i32, i32, i32, i32) {
    %c0_i32 = arith.constant 0 : i32
    %c0_i32_0 = arith.constant 0 : i32
    %c0_i32_1 = arith.constant 0 : i32
    %c0_i32_2 = arith.constant 0 : i32
    return %arg0, %c0_i32, %c0_i32_0, %c0_i32_1 : i32, i32, i32, i32
  }
}

</mosaic_0001>

<bundles_post_ra>
// kernel: tpu_custom_call.1
= control target key start
LH: loop header
LB: loop body
LE: loop exit
PB: predicated region body
PF: predicated region fallthrough
CT: control target
= control target key end

     0   :  { %9 = vsyncpa [#allocation3], 0  ;;  %s3655_s0 = inlined_call_operand.vmem [shape: bf16[2,18,18,4], index: 0, kind: input, shape index: {}]   ;;  %s3656_s1 = inlined_call_operand.vmem [shape: bf16[36,128], index: 1, kind: input, shape index: {}]   ;;  %s3657_s2 = inlined_call_operand.vmem [shape: f32[1,128], index: 2, kind: input, shape index: {}]   ;;  %s3658_s3 = inlined_call_operand.vmem [shape: f32[1,128], index: 3, kind: input, shape index: {}]   ;;  %s3659_s4 = inlined_call_operand.hbm [shape: f32[2,16,16,128], index: 4, kind: output, shape index: {}]  }
   0x1   :  { %11 = vsyncpa [#allocation3 + $0x1], 0  ;;  %s2342_s15 = smov 0   ;;  %s2344_s16 = smov 0  }
   0x2   :  { %s2346_s17 = smov 0   ;;  %s2348_s18 = smov 0  }
   0x3 LB: > { %s2363_s19 = sadd.s32 4294967295, %s2305_s18   ;;  %s2003_s20 = sadd.s32 4294967294, %s2305_s18   ;;  %s2305_s18 = sphi %s2348_s18, %s3690_s18   ;;  %s2301_s17 = sphi %s2346_s17, %s3689_s17   ;;  %s2297_s16 = sphi %s2344_s16, %s3688_s16   ;;  %s2293_s15 = sphi %s2342_s15, %s3687_s15  }
   0x4   : > { %s2367_s21 = sadd.s32 1, %s2305_s18   ;;  %s113_s22 = sadd.s32 1, %s2301_s17 }
   0x5   : > { %s110_s23 = ssub.s32 %s2305_s18, %s2367_s21  ;;  %p123_p0 = scmp.ne.s32.totalorder %s2301_s17, %s2297_s16 }
   0x6   : > { %p111_p1 = scmp.eq.s32.totalorder %s110_s23, 0  ;;  %p124_p2 = scmp.eq.s32.totalorder %s2363_s19, 1 }
   0x7   : > { %p129_p3 = scmp.ne.s32.totalorder %s2297_s16, %s2293_s15  ;;  %p130_p4 = scmp.eq.s32.totalorder %s2003_s20, 1 }
   0x8   : > { %s2378_s24 = scalar_select %p111_p1, %s2301_s17, %s113_s22  }
   0x9   : > { %p2380_p5 = por %p124_p2, %p123_p0  ;;  %p2384_p6 = por %p130_p4, %p129_p3 }
   0xa   : > { %p2006_p7 = scmp.ge.s32.totalorder %s2305_s18, 1  ;;  %p165_p8 = scmp.lt.s32.totalorder %s2305_s18, 3 }
   0xc   : > { %p166_p9 = pnand %p2006_p7, %p165_p8 }
   0xe   : > { %169 = sbr.rel (%p166_p9) target bundleno = 650 (0x28a), region = 36 }
  0x15   : > { %p191_p10 = scmp.lt.s32.totalorder %s2363_s19, 1  ;;  %vm686_vm0 = vcmask 1042432   ;;  %vm687_vm1 = vcmask 1046532   ;;  %vm251_vm2 = vsmask.f32 3328  ;;  %s2307_s6 = smov 12  }
  0x16   : > { %vm252_vm3 = vsmask.f32 7440  ;;  %vm2427_vm4 = vmor %vm686_vm0, %vm687_vm1  ;;  %s2308_s7 = smov 8   ;;  %s2309_s8 = smov 4   ;;  %vm1620_vm6 = vcmask 1041408   ;;  %vm1287_vm7 = vcmask 31744  }
  0x17   : > { %s192_s27 = scalar_select %p191_p10, %s2363_s19, 1  ;;  %vm2472_vm5 = vmor %vm251_vm2, %vm252_vm3  ;;  %vm1336_vm8 = vcmask 64512   ;;  %vm1369_vm9 = vcmask 97280   ;;  %vm1402_vm10 = vcmask 130048   ;;  %vm1435_vm11 = vcmask 162816  }
  0x18   : > { %s2310_s9 = smov 16   ;;  %s2311_s10 = smov 20   ;;  %vm1468_vm12 = vcmask 195584   ;;  %vm1501_vm13 = vcmask 228352   ;;  %vm1534_vm14 = vcmask 261120   ;;  %vm1587_vm15 = vcmask 293888  }
  0x19   : > { %s2173_s28 = smul.u32 216, %s192_s27  ;;  %s2312_s11 = smov 24  }
  0x1a   : > { %s2313_s14 = smov 28   ;;  %s2314_s23 = smov 32  }
  0x1b   : > { %s2395_s5 = scalar_lea.vmem %s3655_s0, %s2173_s28  ;;  %s188_s29 = sand.u32 1, %s2297_s16  }
  0x1c   : > { %v2398_v0 = vld [vmem:[%s2395_s5 + $0x6c] sm:$0xf]  ;;  %v2401_v1 = vld [vmem:[%s2395_s5 + $0x70] sm:$0xf]  ;;  %v2415_v12 = vld [vmem:[%s2395_s5 + $0x60] sm:$0xf] }
  0x1d   : > { %v200_v2 = vld [vmem:[%s2395_s5 + $0xc] sm:$0xf]  ;;  %v484_v3 = vshrl.u32 %v2401_v1, 16  ;;  %v2407_v4 = vcombine.low %v2398_v0, %v2401_v1  ;;  %v471_v5 = vshrl.u32 %v2398_v0, 16  ;;  %v474_v6 = vshll.u32 %v2398_v0, 16 }
  0x1e   : > { %v201_v7 = vld [vmem:[%s2395_s5 + $0x10] sm:$0xf]  ;;  %v279_v11 = vshrl.u32 %v200_v2, 16  ;;  %v282_v13 = vshll.u32 %v200_v2, 16  ;;  %v2420_v14 = vld [vmem:[%s2395_s5 + $0x64] sm:$0xf] }
  0x1f   : > { %v288_v8 = vshll.u32 %v201_v7, 16  ;;  %v292_v9 = vshrl.u32 %v201_v7, 16  ;;  %v2412_v10 = vcombine.low %v200_v2, %v201_v7  ;;  %1096 = vrot.lane.b32.xlu1 %v2407_v4, %s2307_s6  ;;  %v2423_v15 = vld [vmem:[%s2395_s5 + $0x68] sm:$0x1]  ;;  %v2017_v17 = vrot.slane %v2415_v12, 9 }
  0x20   : > { %v281_v19 = vrot.slane %v279_v11, 4  ;;  %v747_v20 = vrot.slane %v2420_v14, 5  ;;  %v750_v21 = vrot.slane %v2423_v15, 5  ;;  %v2437_v22 = vld [vmem:[%s2395_s5] sm:$0xf]  ;;  %v284_v23 = vrot.slane %v282_v13, 5 }
  0x21   : > { %v294_v18 = vrot.slane %v292_v9, 4  ;;  %1080 = vrot.lane.b32.xlu0 %v2412_v10, %s2307_s6  ;;  %v2440_v24 = vld [vmem:[%s2395_s5 + $0x4] sm:$0xf]  ;;  %v199_v25 = vld [vmem:[%s2395_s5 + $0x8] sm:$0x1]  ;;  %v2009_v26 = vrot.slane %v2437_v22, 9 }
  0x22   : > { %v748_v27 = vsel %vm2427_vm4, %v2017_v17, %v747_v20  ;;  %v749_v28 = vrot.slane %v747_v20, 4  ;;  %v691_v29 = vrot.slane %v2440_v24, 5  ;;  %v694_v30 = vrot.slane %v199_v25, 5  ;;  %v2448_v31 = vld [vmem:[%s2395_s5 + $0x74] sm:$0x1] }
  0x23   : > { %v2018_v32 = vrot.slane %v2398_v0, 9  ;;  %v754_v33 = vrot.slane %v2401_v1, 5  ;;  %v757_v34 = vrot.slane %v2448_v31, 5  ;;  %v202_v35 = vld [vmem:[%s2395_s5 + $0x14] sm:$0x1]  ;;  %v2010_v36 = vrot.slane %v200_v2, 9 }
  0x24   : > { %v751_v37 = vsel %vm2427_vm4, %v749_v28, %v750_v21  ;;  %v692_v38 = vsel %vm2427_vm4, %v2009_v26, %v691_v29  ;;  %v693_v39 = vrot.slane %v691_v29, 4  ;;  %v698_v40 = vrot.slane %v201_v7, 5 }
  0x25   : > { %v2458_v41 = vcombine.low %v748_v27, %v751_v37  ;;  %v755_v42 = vsel %vm2427_vm4, %v2018_v32, %v754_v33  ;;  %v756_v43 = vrot.slane %v754_v33, 4  ;;  %v701_v44 = vrot.slane %v202_v35, 5 }
  0x26   : > { %v695_v45 = vsel %vm2427_vm4, %v693_v39, %v694_v30  ;;  %v699_v46 = vsel %vm2427_vm4, %v2010_v36, %v698_v40  ;;  %v700_v47 = vrot.slane %v698_v40, 4  ;;  %v285_v48 = vor.u32 %v284_v23, %v281_v19  ;;  %v2516_v39 = vld [vmem:[%s2395_s5 + $0x7c] sm:$0xf] }
  0x27   : > { %1061 = vrot.lane.b32.xlu1 %v2458_v41, %s2308_s7  ;;  %v2059_v49 = vcombine.low %v692_v38, %v695_v45  ;;  %v758_v50 = vsel %vm2427_vm4, %v756_v43, %v757_v34  ;;  %v290_v52 = vrot.slane %v288_v8, 5  ;;  %v298_v53 = vshll.u32 %v202_v35, 16  ;;  %v2511_v35 = vld [vmem:[%s2395_s5 + $0x78] sm:$0xf] }
  0x28   : > { %v2476_v54 = vcombine.low %v755_v42, %v758_v50  ;;  %v702_v55 = vsel %vm2427_vm4, %v700_v47, %v701_v44  ;;  %v286_v56 = vrot.slane %v285_v48, 4  ;;  %v255_v57 = vshrl.u32 %v2437_v22, 16  ;;  %v2528_v50 = vld [vmem:[%s2395_s5 + $0x1c] sm:$0xf] }
  0x29   : > { %1045 = vrot.lane.b32.xlu0 %v2059_v49, %s2308_s7  ;;  %v2482_v58 = vcombine.low %v699_v46, %v702_v55  ;;  %v295_v59 = vor.u32 %v294_v18, %v290_v52  ;;  %v300_v60 = vrot.slane %v298_v53, 5  ;;  %v258_v61 = vshll.u32 %v2437_v22, 16  ;;  %v2525_v49 = vld [vmem:[%s2395_s5 + $0x18] sm:$0xf] }
  0x2a   : > { %3673 = vst [vmem:[#allocation5_spill] sm:$0xff] %v2476_v54  ;;  %v291_v62 = vsel %vm2472_vm5, %v286_v56, %v290_v52  ;;  %v257_v63 = vrot.slane %v255_v57, 4  ;;  %v264_v2 = vshll.u32 %v2440_v24, 16  ;;  %v268_v7 = vshrl.u32 %v2440_v24, 16 }
  0x2b   : > { %1063 = vrot.lane.b32.xlu1 %v2476_v54, %s2308_s7  ;;  %v296_v8 = vrot.slane %v295_v59, 4  ;;  %v260_v9 = vrot.slane %v258_v61, 5  ;;  %v274_v11 = vshll.u32 %v199_v25, 16  ;;  %v473_v13 = vrot.slane %v471_v5, 4 }
  0x2c   : > { %v266_v17 = vrot.slane %v264_v2, 5  ;;  %v270_v18 = vrot.slane %v268_v7, 4  ;;  %v476_v19 = vrot.slane %v474_v6, 5  ;;  %v480_v20 = vshll.u32 %v2401_v1, 16 }
  0x2d   : > { %1047 = vrot.lane.b32.xlu0 %v2482_v58, %s2308_s7  ;;  %v301_v21 = vsel %vm2472_vm5, %v296_v8, %v300_v60  ;;  %v261_v23 = vor.u32 %v260_v9, %v257_v63  ;;  %v276_v26 = vrot.slane %v274_v11, 5  ;;  %v486_v25 = vrot.slane %v484_v3, 4  ;;  %v229_v60 = vld [vmem:[%s2395_s5 + $0x80] sm:$0x1] }
  0x2e   : > { %v2502_v5 = vcombine.low %v291_v62, %v301_v21  ;;  %v271_v27 = vor.u32 %v270_v18, %v266_v17  ;;  %v477_v28 = vor.u32 %v476_v19, %v473_v13  ;;  %v482_v0 = vrot.slane %v480_v20, 5  ;;  %v2552_v20 = vld [vmem:[%s2395_s5 + $0x20] sm:$0x1] }
  0x2f   : > { %v262_v6 = vrot.slane %v261_v23, 4  ;;  %v490_v29 = vshll.u32 %v2448_v31, 16  ;;  %v447_v30 = vshrl.u32 %v2415_v12, 16  ;;  %v450_v32 = vshll.u32 %v2415_v12, 16 }
  0x30   : > { %967 = vrot.lane.b32.xlu1 %v2502_v5, %s2309_s8  ;;  %v272_v1 = vrot.slane %v271_v27, 4  ;;  %v478_v33 = vrot.slane %v477_v28, 4  ;;  %v487_v3 = vor.u32 %v486_v25, %v482_v0  ;;  %v456_v34 = vshll.u32 %v2420_v14, 16 }
  0x31   : > { %v267_v31 = vsel %vm2472_vm5, %v262_v6, %v266_v17  ;;  %v492_v36 = vrot.slane %v490_v29, 5  ;;  %v449_v37 = vrot.slane %v447_v30, 4  ;;  %v452_v38 = vrot.slane %v450_v32, 5 }
  0x32   : > { %v277_v40 = vsel %vm2472_vm5, %v272_v1, %v276_v26  ;;  %v483_v42 = vsel %vm2472_vm5, %v478_v33, %v482_v0  ;;  %v488_v43 = vrot.slane %v487_v3, 4  ;;  %v458_v44 = vrot.slane %v456_v34, 5 }
  0x33   : > { %v2043_v45 = vcombine.low %v267_v31, %v277_v40  ;;  %v453_v46 = vor.u32 %v452_v38, %v449_v37  ;;  %v460_v47 = vshrl.u32 %v2420_v14, 16  ;;  %v466_v48 = vshll.u32 %v2423_v15, 16 }
  0x34   : > { %v493_v52 = vsel %vm2472_vm5, %v488_v43, %v492_v36  ;;  %v495_v53 = vshrl.u32 %v2511_v35, 16  ;;  %v498_v55 = vshll.u32 %v2511_v35, 16  ;;  %v508_v56 = vshrl.u32 %v2516_v39, 16 }
  0x35   : > { %965 = vrot.lane.b32.xlu0 %v2043_v45, %s2309_s8  ;;  %v2536_v57 = vcombine.low %v483_v42, %v493_v52  ;;  %v454_v59 = vrot.slane %v453_v46, 4  ;;  %v462_v15 = vrot.slane %v460_v47, 4  ;;  %v468_v61 = vrot.slane %v466_v48, 5  ;;  %v2579_v52 = vld [vmem:[%s2395_s5 + $0x84] sm:$0xf] }
  0x36   : > { %v303_v62 = vshrl.u32 %v2525_v49, 16  ;;  %v306_v63 = vshll.u32 %v2525_v49, 16  ;;  %v316_v2 = vshrl.u32 %v2528_v50, 16  ;;  %v2548_v9 = vcombine.low %v2511_v35, %v2516_v39 }
  0x37   : > { %3674 = vst [vmem:[#allocation6_spill] sm:$0xff] %v2536_v57  ;;  %983 = vrot.lane.b32.xlu1 %v2536_v57, %s2309_s8  ;;  %v459_v7 = vsel %vm2472_vm5, %v454_v59, %v458_v44  ;;  %v463_v8 = vor.u32 %v462_v15, %v458_v44  ;;  %v497_v11 = vrot.slane %v495_v53, 4  ;;  %v500_v13 = vrot.slane %v498_v55, 5  ;;  %v2582_v53 = vld [vmem:[%s2395_s5 + $0x88] sm:$0xf] }
  0x38   : > { %v504_v17 = vshll.u32 %v2516_v39, 16  ;;  %v510_v18 = vrot.slane %v508_v56, 4  ;;  %v514_v19 = vshll.u32 %v229_v60, 16  ;;  %v305_v23 = vrot.slane %v303_v62, 4 }
  0x39   : > { %v464_v21 = vrot.slane %v463_v8, 4  ;;  %v308_v26 = vrot.slane %v306_v63, 5  ;;  %v312_v25 = vshll.u32 %v2528_v50, 16  ;;  %v501_v27 = vor.u32 %v500_v13, %v497_v11  ;;  %v2612_v13 = vld [vmem:[%s2395_s5 + $0x24] sm:$0xf] }
  0x3a   : > { %v506_v28 = vrot.slane %v504_v17, 5  ;;  %v318_v0 = vrot.slane %v316_v2, 4  ;;  %v322_v32 = vshll.u32 %v2552_v20, 16  ;;  %v516_v34 = vrot.slane %v514_v19, 5  ;;  %v2615_v17 = vld [vmem:[%s2395_s5 + $0x28] sm:$0xf] }
  0x3b   : > { %v469_v6 = vsel %vm2472_vm5, %v464_v21, %v468_v61  ;;  %1098 = vrot.lane.b32.xlu1 %v2548_v9, %s2307_s6  ;;  %v309_v29 = vor.u32 %v308_v26, %v305_v23  ;;  %v314_v30 = vrot.slane %v312_v25, 5  ;;  %v502_v33 = vrot.slane %v501_v27, 4  ;;  %v2618_v23 = vld [vmem:[%s2395_s5 + $0x8c] sm:$0x1] }
  0x3c   : > { %v2560_v1 = vcombine.low %v459_v7, %v469_v6  ;;  %v511_v3 = vor.u32 %v510_v18, %v506_v28  ;;  %v761_v36 = vrot.slane %v2516_v39, 5  ;;  %v2567_v37 = vcombine.low %v2525_v49, %v2528_v50 }
  0x3d   : > { %v319_v31 = vor.u32 %v318_v0, %v314_v30  ;;  %v507_v38 = vsel %vm2472_vm5, %v502_v33, %v506_v28  ;;  %v310_v42 = vrot.slane %v309_v29, 4  ;;  %v324_v44 = vrot.slane %v322_v32, 5 }
  0x3e   : > { %981 = vrot.lane.b32.xlu0 %v2560_v1, %s2309_s8  ;;  %v512_v40 = vrot.slane %v511_v3, 4  ;;  %v2019_v39 = vrot.slane %v2511_v35, 9  ;;  %v763_v46 = vrot.slane %v761_v36, 4  ;;  %v764_v47 = vrot.slane %v229_v60, 5 }
  0x3f   : > { %1131 = vrot.lane.b32.xlu1 %v2536_v57, %s2310_s9  ;;  %v320_v43 = vrot.slane %v319_v31, 4  ;;  %v315_v35 = vsel %vm2472_vm5, %v310_v42, %v314_v30  ;;  %v705_v59 = vrot.slane %v2528_v50, 5  ;;  %v519_v60 = vshrl.u32 %v2579_v52, 16  ;;  %v208_v42 = vld [vmem:[%s2395_s5 + $0x2c] sm:$0x1] }
  0x40   : > { %v517_v45 = vsel %vm2472_vm5, %v512_v40, %v516_v34  ;;  %v762_v56 = vsel %vm2427_vm4, %v2019_v39, %v761_v36  ;;  %v765_v15 = vsel %vm2427_vm4, %v763_v46, %v764_v47  ;;  %v522_v61 = vshll.u32 %v2579_v52, 16  ;;  %v2236_v46 = vld [vmem:[%s3656_s1] sm:$0xff]  }
  0x41   : > { %v2576_v48 = vcombine.low %v507_v38, %v517_v45  ;;  %v325_v55 = vsel %vm2472_vm5, %v320_v43, %v324_v44  ;;  %v532_v62 = vshrl.u32 %v2582_v53, 16  ;;  %v528_v63 = vshll.u32 %v2582_v53, 16  ;;  %2127 = vmatprep.subr.bf16.mxu0 %v2236_v46  ;;  %2165 = vmatprep.subr.bf16.mxu1 %v2236_v46 }
  0x42   : > { %1082 = vrot.lane.b32.xlu0 %v2567_v37, %s2307_s6  ;;  %v2603_v2 = vcombine.low %v315_v35, %v325_v55  ;;  %v2011_v7 = vrot.slane %v2525_v49, 9  ;;  %v2608_v50 = vcombine.low %v762_v56, %v765_v15  ;;  %v707_v8 = vrot.slane %v705_v59, 4  ;;  %2128 = vmatpush3.bf16.msra.mxu0 %v2236_v46 }
  0x43   : > { %1133 = vrot.lane.b32.xlu1 %v2576_v48, %s2310_s9  ;;  %v708_v11 = vrot.slane %v2552_v20, 5  ;;  %v521_v18 = vrot.slane %v519_v60, 4  ;;  %v524_v19 = vrot.slane %v522_v61, 5  ;;  %v534_v21 = vrot.slane %v532_v62, 4  ;;  %2168 = vmatpush3.bf16.msra.mxu1 %v2236_v46  ;;  %v2237_v60 = vld [vmem:[%s3656_s1 + $0x8] sm:$0xff]  }
  0x44   : > { %v706_v49 = vsel %vm2427_vm4, %v2011_v7, %v705_v59  ;;  %v327_v26 = vshrl.u32 %v2612_v13, 16  ;;  %v330_v25 = vshll.u32 %v2612_v13, 16  ;;  %v340_v27 = vshrl.u32 %v2615_v17, 16  ;;  %2129 = vmatprep.subr.bf16.mxu0 %v2237_v60  ;;  %2166 = vmatprep.subr.bf16.mxu1 %v2237_v60 }
  0x45   : > { %v709_v20 = vsel %vm2427_vm4, %v707_v8, %v708_v11  ;;  %v336_v28 = vshll.u32 %v2615_v17, 16  ;;  %v525_v0 = vor.u32 %v524_v19, %v521_v18  ;;  %v538_v29 = vshll.u32 %v2618_v23, 16 }
  0x46   : > { %1115 = vrot.lane.b32.xlu0 %v2502_v5, %s2310_s9  ;;  %v530_v5 = vrot.slane %v528_v63, 5  ;;  %v2635_v30 = vcombine.low %v706_v49, %v709_v20  ;;  %v2639_v32 = vcombine.low %v2579_v52, %v2582_v53  ;;  %v329_v33 = vrot.slane %v327_v26, 4  ;;  %2130 = vmatpush3.bf16.msra.mxu0 %v2237_v60  ;;  %v2706_v49 = vld [vmem:[%s2395_s5 + $0x90] sm:$0xf]  ;;  %v2709_v26 = vld [vmem:[%s2395_s5 + $0x94] sm:$0xf] }
  0x47   : > { %1166 = vrot.lane.b32.xlu1 %v2476_v54, %s2311_s10  ;;  %v332_v3 = vrot.slane %v330_v25, 5  ;;  %v338_v34 = vrot.slane %v336_v28, 5  ;;  %v342_v31 = vrot.slane %v340_v27, 4  ;;  %v526_v36 = vrot.slane %v525_v0, 4  ;;  %2169 = vmatpush3.bf16.msra.mxu1 %v2237_v60  ;;  %v2729_v0 = vld [vmem:[%s2395_s5 + $0x34] sm:$0xf] }
  0x48   : > { %v535_v6 = vor.u32 %v534_v21, %v530_v5  ;;  %v540_v40 = vrot.slane %v538_v29, 5  ;;  %v346_v44 = vshll.u32 %v208_v42, 16  ;;  %v2659_v47 = vcombine.low %v2612_v13, %v2615_v17  ;;  %v211_v60 = vld [vmem:[%s2395_s5 + $0x38] sm:$0x1] }
  0x49   : > { %v343_v43 = vor.u32 %v342_v31, %v338_v34  ;;  %v531_v39 = vsel %vm2472_vm5, %v526_v36, %v530_v5  ;;  %v768_v15 = vrot.slane %v2582_v53, 5  ;;  %v2020_v53 = vrot.slane %v2579_v52, 9 }
  0x4a   : > { %1117 = vrot.lane.b32.xlu0 %v2603_v2, %s2310_s9  ;;  %v536_v38 = vrot.slane %v535_v6, 4  ;;  %3675 = vst [vmem:[#allocation7_spill] sm:$0xff] %v2659_v47  ;;  %v348_v59 = vrot.slane %v346_v44, 5  ;;  %v771_v7 = vrot.slane %v2618_v23, 5  ;;  %v712_v11 = vrot.slane %v2615_v17, 5 }
  0x4b   : > { %1168 = vrot.lane.b32.xlu1 %v2608_v50, %s2311_s10  ;;  %v344_v56 = vrot.slane %v343_v43, 4  ;;  %v770_v63 = vrot.slane %v768_v15, 4  ;;  %v769_v52 = vsel %vm2427_vm4, %v2020_v53, %v768_v15  ;;  %v2012_v5 = vrot.slane %v2612_v13, 9  ;;  %v2240_v44 = vld [vmem:[%s3656_s1 + $0x10] ss:$0 sps:$4 sm:$0x33]  }
  0x4c   : > { %v541_v45 = vsel %vm2472_vm5, %v536_v38, %v540_v40  ;;  %v714_v21 = vrot.slane %v712_v11, 4  ;;  %v715_v23 = vrot.slane %v208_v42, 5  ;;  %v543_v20 = vshrl.u32 %v2706_v49, 16  ;;  %2171 = vmatprep.subr.msk.bf16.mxu0 %vm1620_vm6, %v2240_v44  ;;  %2172 = vmatprep.subr.msk.bf16.mxu1 %vm1620_vm6, %v2240_v44 }
  0x4d   : > { %v2663_v35 = vcombine.low %v531_v39, %v541_v45  ;;  %v349_v62 = vsel %vm2472_vm5, %v344_v56, %v348_v59  ;;  %v772_v18 = vsel %vm2427_vm4, %v770_v63, %v771_v7  ;;  %v713_v17 = vsel %vm2427_vm4, %v2012_v5, %v712_v11 }
  0x4e   : > { %1150 = vrot.lane.b32.xlu0 %v2482_v58, %s2311_s10  ;;  %v333_v58 = vor.u32 %v332_v3, %v329_v33  ;;  %v2694_v19 = vcombine.low %v769_v52, %v772_v18  ;;  %v546_v25 = vshll.u32 %v2706_v49, 16  ;;  %v556_v27 = vshrl.u32 %v2709_v26, 16 }
  0x4f   : > { %1201 = vrot.lane.b32.xlu1 %v2548_v9, %s2312_s11  ;;  %v552_v28 = vshll.u32 %v2709_v26, 16  ;;  %v545_v6 = vrot.slane %v543_v20, 4  ;;  %v360_v38 = vshll.u32 %v2729_v0, 16  ;;  %v2744_v43 = vcombine.low %v2706_v49, %v2709_v26  ;;  %v2773_v20 = vld [vmem:[%s2395_s5 + $0x9c] sm:$0xf] }
  0x50   : > { %v334_v55 = vrot.slane %v333_v58, 4  ;;  %v548_v29 = vrot.slane %v546_v25, 5  ;;  %v558_v3 = vrot.slane %v556_v27, 4  ;;  %v370_v53 = vshll.u32 %v211_v60, 16  ;;  %v2776_v25 = vld [vmem:[%s2395_s5 + $0xa0] sm:$0xf] }
  0x51   : > { %v554_v33 = vrot.slane %v552_v28, 5  ;;  %3676 = vst [vmem:[#allocation8_spill] sm:$0xff] %v2744_v43  ;;  %v362_v46 = vrot.slane %v360_v38, 5  ;;  %v775_v11 = vrot.slane %v2709_v26, 5  ;;  %v2021_v18 = vrot.slane %v2706_v49, 9 }
  0x52   : > { %1152 = vrot.lane.b32.xlu0 %v2635_v30, %s2311_s10  ;;  %v339_v61 = vsel %vm2472_vm5, %v334_v55, %v338_v34  ;;  %v235_v34 = vld [vmem:[%s2395_s5 + $0x98] sm:$0x1]  ;;  %v549_v40 = vor.u32 %v548_v29, %v545_v6  ;;  %v719_v27 = vrot.slane %v2729_v0, 5  ;;  %v567_v6 = vshrl.u32 %v2773_v20, 16 }
  0x53   : > { %1203 = vrot.lane.b32.xlu1 %v2639_v32, %s2312_s11  ;;  %v2681_v8 = vcombine.low %v339_v61, %v349_v62  ;;  %v559_v42 = vor.u32 %v558_v3, %v554_v33  ;;  %v562_v58 = vshll.u32 %v235_v34, 16  ;;  %v778_v26 = vrot.slane %v235_v34, 5 }
  0x54   : > { %v550_v56 = vrot.slane %v549_v40, 4  ;;  %v776_v28 = vsel %vm2427_vm4, %v2021_v18, %v775_v11  ;;  %v576_v3 = vshll.u32 %v2776_v25, 16  ;;  %v2805_v40 = vld [vmem:[%s2395_s5 + $0x3c] sm:$0xf] }
  0x55   : > { %v560_v59 = vrot.slane %v559_v42, 4  ;;  %v564_v15 = vrot.slane %v562_v58, 5  ;;  %v2808_v42 = vld [vmem:[%s2395_s5 + $0x40] sm:$0xf]  ;;  %v569_v58 = vrot.slane %v567_v6, 4 }
  0x56   : > { %1185 = vrot.lane.b32.xlu0 %v2567_v37, %s2312_s11  ;;  %v555_v63 = vsel %vm2472_vm5, %v550_v56, %v554_v33  ;;  %v580_v33 = vshrl.u32 %v2776_v25, 16  ;;  %v388_v56 = vshrl.u32 %v2808_v42, 16 }
  0x57   : > { %1236 = vrot.lane.b32.xlu1 %v2576_v48, %s2313_s14  ;;  %v565_v7 = vsel %vm2472_vm5, %v560_v59, %v564_v15  ;;  %v384_v59 = vshll.u32 %v2808_v42, 16 }
  0x58   : > { %v2770_v5 = vcombine.low %v555_v63, %v565_v7 }
  0x59   : > { %v386_v7 = vrot.slane %v384_v59, 5 }
  0x5a   : > { %1187 = vrot.lane.b32.xlu0 %v2659_v47, %s2312_s11 }
  0x5b   : > { %1238 = vrot.lane.b32.xlu1 %v2663_v35, %s2313_s14 }
  0x5e   : > { %1220 = vrot.lane.b32.xlu0 %v2603_v2, %s2313_s14 }
  0x5f   : > { %1271 = vrot.lane.b32.xlu1 %v2608_v50, %s2314_s23 }
  0x62   : > { %1222 = vrot.lane.b32.xlu0 %v2681_v8, %s2313_s14 }
  0x63   : > { %985 = vrot.lane.b32.xlu1 %v2576_v48, %s2309_s8  ;;  %v716_v48 = vsel %vm2427_vm4, %v714_v21, %v715_v23 }
  0x64   : > { %v2713_v13 = vcombine.low %v713_v17, %v716_v48  ;;  %v372_v17 = vrot.slane %v370_v53, 5  ;;  %v777_v48 = vrot.slane %v775_v11, 4  ;;  %v390_v11 = vrot.slane %v388_v56, 4 }
  0x66   : > { %1255 = vrot.lane.b32.xlu0 %v2635_v30, %s2314_s23  ;;  %v779_v29 = vsel %vm2427_vm4, %v777_v48, %v778_v26  ;;  %v391_v26 = vor.u32 %v390_v11, %v386_v7 }
  0x67   : > { %1273 = vrot.lane.b32.xlu1 %v2694_v19, %s2314_s23  ;;  %v2802_v38 = vcombine.low %v776_v28, %v779_v29  ;;  %v2848_v28 = vcombine.low %v2805_v40, %v2808_v42 }
  0x69   : > { %3679 = vst [vmem:[#allocation11_spill] sm:$0xff] %v2848_v28 }
  0x6a   : > { %969 = vrot.lane.b32.xlu0 %v2603_v2, %s2309_s8  ;;  %v2726_v2 = vld [vmem:[%s2395_s5 + $0x30] sm:$0xf] }
  0x6b   : > { %987 = vrot.lane.b32.xlu1 %v2663_v35, %s2309_s8  ;;  %v351_v31 = vshrl.u32 %v2726_v2, 16  ;;  %v354_v36 = vshll.u32 %v2726_v2, 16  ;;  %v2765_v52 = vcombine.low %v2726_v2, %v2729_v0 }
  0x6d   : > { %v353_v39 = vrot.slane %v351_v31, 4  ;;  %v356_v45 = vrot.slane %v354_v36, 5  ;;  %3677 = vst [vmem:[#allocation9_spill] sm:$0xff] %v2765_v52  ;;  %v2013_v31 = vrot.slane %v2726_v2, 9  ;;  %v721_v36 = vrot.slane %v719_v27, 4 }
  0x6e   : > { %1257 = vrot.lane.b32.xlu0 %v2713_v13, %s2314_s23 }
  0x6f   : > { %1065 = vrot.lane.b32.xlu1 %v2608_v50, %s2308_s7  ;;  %v364_v50 = vshrl.u32 %v2729_v0, 16  ;;  %v357_v61 = vor.u32 %v356_v45, %v353_v39  ;;  %v570_v0 = vshll.u32 %v2773_v20, 16  ;;  %v578_v39 = vrot.slane %v576_v3, 5 }
  0x70   : > { %v582_v45 = vrot.slane %v580_v33, 4  ;;  %v720_v2 = vsel %vm2427_vm4, %v2013_v31, %v719_v27  ;;  %v782_v31 = vrot.slane %v2776_v25, 5 }
  0x71   : > { %v366_v55 = vrot.slane %v364_v50, 4  ;;  %v358_v21 = vrot.slane %v357_v61, 4  ;;  %v722_v50 = vrot.slane %v211_v60, 5 }
  0x72   : > { %971 = vrot.lane.b32.xlu0 %v2681_v8, %s2309_s8  ;;  %v583_v60 = vor.u32 %v582_v45, %v578_v39 }
  0x73   : > { %1067 = vrot.lane.b32.xlu1 %v2694_v19, %s2308_s7  ;;  %v367_v62 = vor.u32 %v366_v55, %v362_v46  ;;  %v378_v55 = vshll.u32 %v2805_v40, 16 }
  0x75   : > { %v368_v23 = vrot.slane %v367_v62, 4  ;;  %v2829_v62 = vcombine.low %v2773_v20, %v2776_v25  ;;  %v380_v63 = vrot.slane %v378_v55, 5 }
  0x76   : > { %1049 = vrot.lane.b32.xlu0 %v2635_v30, %s2308_s7  ;;  %v1622_v30 = vsel %vm1620_vm6, %v2240_v44, 0  ;;  %v572_v44 = vrot.slane %v570_v0, 5  ;;  %v392_v0 = vrot.slane %v391_v26, 4 }
  0x77   : > { %1100 = vrot.lane.b32.xlu1 %v2639_v32, %s2307_s6  ;;  %2132 = vmatpush3.bf16.msra.mxu0 %v1622_v30  ;;  %v373_v49 = vsel %vm2472_vm5, %v368_v23, %v372_v17  ;;  %3678 = vst [vmem:[#allocation10_spill] sm:$0xff] %v2829_v62  ;;  %v214_v17 = vld [vmem:[%s2395_s5 + $0x44] sm:$0x1] }
  0x78   : > { %2170 = vmatpush3.bf16.msra.mxu1 %v1622_v30  ;;  %v573_v15 = vor.u32 %v572_v44, %v569_v58  ;;  %v394_v27 = vshll.u32 %v214_v17, 16  ;;  %v2022_v44 = vrot.slane %v2773_v20, 9 }
  0x7a   : > { %1051 = vrot.lane.b32.xlu0 %v2713_v13, %s2308_s7  ;;  %v574_v18 = vrot.slane %v573_v15, 4  ;;  %v396_v33 = vrot.slane %v394_v27, 5  ;;  %v783_v20 = vsel %vm2427_vm4, %v2022_v44, %v782_v31  ;;  %v729_v15 = vrot.slane %v214_v17, 5  ;;  %v2934_v27 = vld [vmem:[%s2395_s5 + $0x4c] sm:$0xf] }
  0x7b   : > { %1102 = vrot.lane.b32.xlu1 %v2744_v43, %s2307_s6  ;;  %v408_v44 = vshll.u32 %v2934_v27, 16 }
  0x7c   : > { %v397_v58 = vsel %vm2472_vm5, %v392_v0, %v396_v33 }
  0x7e   : > { %1084 = vrot.lane.b32.xlu0 %v2659_v47, %s2307_s6 }
  0x7f   : > { %1135 = vrot.lane.b32.xlu1 %v2663_v35, %s2310_s9  ;;  %v363_v35 = vsel %vm2472_vm5, %v358_v21, %v362_v46  ;;  %v375_v46 = vshrl.u32 %v2805_v40, 16  ;;  %v584_v21 = vrot.slane %v583_v60, 4 }
  0x80   : > { %v2797_v34 = vcombine.low %v363_v35, %v373_v49  ;;  %v579_v35 = vsel %vm2472_vm5, %v574_v18, %v578_v39  ;;  %v784_v39 = vrot.slane %v782_v31, 4  ;;  %v241_v31 = vld [vmem:[%s2395_s5 + $0xb0] sm:$0x1] }
  0x81   : > { %v377_v53 = vrot.slane %v375_v46, 4  ;;  %v726_v46 = vrot.slane %v2808_v42, 5  ;;  %v2014_v42 = vrot.slane %v2805_v40, 9  ;;  %v2905_v40 = vld [vmem:[%s2395_s5 + $0xa8] sm:$0xf] }
  0x82   : > { %1086 = vrot.lane.b32.xlu0 %v2765_v52, %s2307_s6  ;;  %v591_v18 = vshrl.u32 %v2905_v40, 16 }
  0x83   : > { %1137 = vrot.lane.b32.xlu1 %v2770_v5, %s2310_s9  ;;  %v381_v48 = vor.u32 %v380_v63, %v377_v53  ;;  %v728_v59 = vrot.slane %v726_v46, 4  ;;  %v2908_v63 = vld [vmem:[%s2395_s5 + $0xac] sm:$0xf] }
  0x84   : > { %v600_v17 = vshll.u32 %v2908_v63, 16 }
  0x85   : > { %v382_v29 = vrot.slane %v381_v48, 4 }
  0x86   : > { %1119 = vrot.lane.b32.xlu0 %v2681_v8, %s2310_s9  ;;  %v238_v8 = vld [vmem:[%s2395_s5 + $0xa4] sm:$0x1] }
  0x87   : > { %1170 = vrot.lane.b32.xlu1 %v2694_v19, %s2311_s10  ;;  %v723_v19 = vsel %vm2427_vm4, %v721_v36, %v722_v50  ;;  %v586_v30 = vshll.u32 %v238_v8, 16  ;;  %v387_v50 = vsel %vm2472_vm5, %v382_v29, %v386_v7  ;;  %v785_v45 = vrot.slane %v238_v8, 5 }
  0x88   : > { %v2825_v61 = vcombine.low %v720_v2, %v723_v19  ;;  %v2872_v25 = vcombine.low %v387_v50, %v397_v58  ;;  %v602_v29 = vrot.slane %v600_v17, 5  ;;  %v412_v58 = vshrl.u32 %v2934_v27, 16 }
  0x89   : > { %v588_v23 = vrot.slane %v586_v30, 5  ;;  %v786_v8 = vsel %vm2427_vm4, %v784_v39, %v785_v45  ;;  %v727_v30 = vsel %vm2427_vm4, %v2014_v42, %v726_v46  ;;  %v2955_v42 = vcombine.low %v2905_v40, %v2908_v63 }
  0x8a   : > { %1121 = vrot.lane.b32.xlu0 %v2797_v34, %s2310_s9  ;;  %v2889_v56 = vcombine.low %v783_v20, %v786_v8  ;;  %v610_v20 = vshll.u32 %v241_v31, 16 }
  0x8b   : > { %1172 = vrot.lane.b32.xlu1 %v2802_v38, %s2311_s10  ;;  %v589_v49 = vsel %vm2472_vm5, %v584_v21, %v588_v23  ;;  %v594_v21 = vshll.u32 %v2905_v40, 16  ;;  %v604_v23 = vshrl.u32 %v2908_v63, 16 }
  0x8c   : > { %v2852_v6 = vcombine.low %v579_v35, %v589_v49  ;;  %v593_v35 = vrot.slane %v591_v18, 4  ;;  %v612_v17 = vrot.slane %v610_v20, 5 }
  0x8d   : > { %v596_v49 = vrot.slane %v594_v21, 5  ;;  %v606_v0 = vrot.slane %v604_v23, 4 }
  0x8e   : > { %1154 = vrot.lane.b32.xlu0 %v2713_v13, %s2311_s10 }
  0x8f   : > { %1205 = vrot.lane.b32.xlu1 %v2744_v43, %s2312_s11  ;;  %v597_v45 = vor.u32 %v596_v49, %v593_v35  ;;  %v607_v46 = vor.u32 %v606_v0, %v602_v29  ;;  %v2962_v35 = vld [vmem:[%s2395_s5 + $0x50] sm:$0x1] }
  0x91   : > { %v2838_v13 = vpop.permute.xlu1 %1096  ;;  %v598_v21 = vrot.slane %v597_v45, 4  ;;  %v608_v23 = vrot.slane %v607_v46, 4  ;;  %v789_v45 = vrot.slane %v2908_v63, 5 }
  0x92   : > { %1156 = vrot.lane.b32.xlu0 %v2825_v61, %s2311_s10 }
  0x93   : > { %1207 = vrot.lane.b32.xlu1 %v2829_v62, %s2312_s11  ;;  %v2854_v3 = vpop.permute.xlu0 %1080 }
  0x96   : > { %1189 = vrot.lane.b32.xlu0 %v2765_v52, %s2312_s11  ;;  %v2999_v52 = vld [vmem:[%s2395_s5 + $0xb8] sm:$0xf] }
  0x97   : > { %1240 = vrot.lane.b32.xlu1 %v2770_v5, %s2313_s14 }
  0x99   : > { %v2857_v36 = vpop.permute.xlu1 %1061 }
  0x9a   : > { %1191 = vrot.lane.b32.xlu0 %v2848_v28, %s2312_s11 }
  0x9b   : > { %1242 = vrot.lane.b32.xlu1 %v2852_v6, %s2313_s14  ;;  %v2874_v19 = vpop.permute.xlu0 %1045 }
  0x9d   : > { %v2868_v2 = vpop.permute.xlu1 %1063 }
  0x9e   : > { %1224 = vrot.lane.b32.xlu0 %v2797_v34, %s2313_s14 }
  0x9f   : > { %1275 = vrot.lane.b32.xlu1 %v2802_v38, %s2314_s23  ;;  %v2892_v60 = vpop.permute.xlu0 %1047 }
  0xa2   : > { %1226 = vrot.lane.b32.xlu0 %v2872_v25, %s2313_s14  ;;  %v2887_v55 = vpop.permute.xlu1 %967 }
  0xa3   : > { %989 = vrot.lane.b32.xlu1 %v2770_v5, %s2309_s8  ;;  %v730_v5 = vsel %vm2427_vm4, %v728_v59, %v729_v15 }
  0xa4   : > { %v2914_v11 = vcombine.low %v727_v30, %v730_v5  ;;  %v410_v30 = vrot.slane %v408_v44, 5  ;;  %v414_v5 = vrot.slane %v412_v58, 4  ;;  %v603_v58 = vsel %vm2472_vm5, %v598_v21, %v602_v29 }
  0xa5   : > { %v613_v44 = vsel %vm2472_vm5, %v608_v23, %v612_v17  ;;  %v791_v23 = vrot.slane %v789_v45, 4  ;;  %v792_v17 = vrot.slane %v241_v31, 5 }
  0xa6   : > { %1259 = vrot.lane.b32.xlu0 %v2825_v61, %s2314_s23  ;;  %v415_v0 = vor.u32 %v414_v5, %v410_v30  ;;  %v2989_v29 = vcombine.low %v603_v58, %v613_v44  ;;  %v628_v58 = vshrl.u32 %v2999_v52, 16 }
  0xa7   : > { %1277 = vrot.lane.b32.xlu1 %v2889_v56, %s2314_s23  ;;  %v2912_v7 = vpop.permute.xlu0 %965 }
  0xa8   : > { %v416_v5 = vrot.slane %v415_v0, 4 }
  0xa9   : > { %v2902_v53 = vpop.permute.xlu1 %983 }
  0xaa   : > { %973 = vrot.lane.b32.xlu0 %v2797_v34, %s2309_s8  ;;  %v2929_v34 = vld [vmem:[%s2395_s5 + $0x48] sm:$0xf] }
  0xab   : > { %991 = vrot.lane.b32.xlu1 %v2852_v6, %s2309_s8  ;;  %v402_v50 = vshll.u32 %v2929_v34, 16  ;;  %v2984_v20 = vcombine.low %v2929_v34, %v2934_v27 }
  0xad   : > { %v2922_v48 = vpop.permute.xlu1 %1098  ;;  %v404_v15 = vrot.slane %v402_v50, 5 }
  0xae   : > { %1261 = vrot.lane.b32.xlu0 %v2914_v11, %s2314_s23 }
  0xaf   : > { %1069 = vrot.lane.b32.xlu1 %v2802_v38, %s2308_s7  ;;  %v399_v38 = vshrl.u32 %v2929_v34, 16 }
  0xb0   : > { %v2931_v26 = vpop.permute.xlu0 %981 }
  0xb1   : > { %v2936_v33 = vpop.permute.xlu1 %1131  ;;  %v401_v59 = vrot.slane %v399_v38, 4  ;;  %v418_v38 = vshll.u32 %v2962_v35, 16 }
  0xb2   : > { %975 = vrot.lane.b32.xlu0 %v2872_v25, %s2309_s8 }
  0xb3   : > { %1071 = vrot.lane.b32.xlu1 %v2889_v56, %s2308_s7  ;;  %v420_v21 = vrot.slane %v418_v38, 5 }
  0xb4   : > { %v2947_v39 = vpop.permute.xlu0 %1082 }
  0xb5   : > { %v2949_v8 = vpop.permute.xlu1 %1133 }
  0xb6   : > { %1053 = vrot.lane.b32.xlu0 %v2825_v61, %s2308_s7  ;;  %v405_v61 = vor.u32 %v404_v15, %v401_v59  ;;  %v2023_v59 = vrot.slane %v2905_v40, 9  ;;  %v3003_v40 = vcombine.low %v2415_v12, %v2420_v14 }
  0xb7   : > { %1104 = vrot.lane.b32.xlu1 %v2829_v62, %s2307_s6  ;;  %v2994_v62 = vld [vmem:[%s2395_s5 + $0xb4] sm:$0xf] }
  0xb8   : > { %v2959_v18 = vpop.permute.xlu0 %1115  ;;  %v406_v15 = vrot.slane %v405_v61, 4  ;;  %v421_v61 = vsel %vm2472_vm5, %v416_v5, %v420_v21  ;;  %v790_v0 = vsel %vm2427_vm4, %v2023_v59, %v789_v45  ;;  %v615_v12 = vshrl.u32 %v2994_v62, 16 }
  0xb9   : > { %v2964_v49 = vpop.permute.xlu1 %1166  ;;  %v618_v38 = vshll.u32 %v2994_v62, 16  ;;  %v736_v5 = vrot.slane %v2962_v35, 5  ;;  %v2027_v21 = vcombine.low %v2437_v22, %v2440_v24  ;;  %v630_v22 = vrot.slane %v628_v58, 4 }
  0xba   : > { %1055 = vrot.lane.b32.xlu0 %v2914_v11, %s2308_s7  ;;  %v411_v31 = vsel %vm2472_vm5, %v406_v15, %v410_v30  ;;  %v624_v30 = vshll.u32 %v2999_v52, 16  ;;  %v2015_v15 = vrot.slane %v2929_v34, 9  ;;  %v617_v35 = vrot.slane %v615_v12, 4 }
  0xbb   : > { %1106 = vrot.lane.b32.xlu1 %v2955_v42, %s2307_s6  ;;  %v3029_v45 = vcombine.low %v411_v31, %v421_v61  ;;  %v3047_v31 = vld [vmem:[%s2395_s5 + $0x58] sm:$0xf]  ;;  %v620_v61 = vrot.slane %v618_v38, 5  ;;  %v3078_v57 = vcombine.low %v2994_v62, %v2999_v52  ;;  %v1290_v47 = vsel %vm1287_vm7, %v2027_v21, %v2912_v7 }
  0xbc   : > { %v2971_v50 = vpop.permute.xlu0 %1117  ;;  %v3049_v43 = vrot.slane %v624_v30, 5  ;;  %v432_v58 = vshll.u32 %v3047_v31, 16 }
  0xbd   : > { %v2978_v46 = vpop.permute.xlu1 %1168  ;;  %v621_v30 = vor.u32 %v620_v61, %v617_v35 }
  0xbe   : > { %1088 = vrot.lane.b32.xlu0 %v2848_v28, %s2307_s6 }
  0xbf   : > { %1139 = vrot.lane.b32.xlu1 %v2852_v6, %s2310_s9  ;;  %v733_v6 = vrot.slane %v2934_v27, 5  ;;  %v793_v27 = vsel %vm2427_vm4, %v791_v23, %v792_v17  ;;  %v1314_v23 = vsel %vm1287_vm7, %v3003_v40, %v2931_v26  ;;  %v3042_v17 = vld [vmem:[%s2395_s5 + $0x54] sm:$0xf]  ;;  %v3054_v26 = vld [vmem:[%s2395_s5 + $0xbc] sm:$0x1] }
  0xc0   : > { %v2991_v63 = vpop.permute.xlu0 %1150  ;;  %v3039_v34 = vcombine.low %v790_v0, %v793_v27  ;;  %v1354_v0 = vsel %vm1336_vm8, %v1314_v23, %v2857_v36  ;;  %v423_v27 = vshrl.u32 %v3042_v17, 16  ;;  %v426_v38 = vshll.u32 %v3042_v17, 16 }
  0xc1   : > { %v2996_v28 = vpop.permute.xlu1 %1201  ;;  %v735_v59 = vrot.slane %v733_v6, 4 }
  0xc2   : > { %1090 = vrot.lane.b32.xlu0 %v2984_v20, %s2307_s6  ;;  %v425_v61 = vrot.slane %v423_v27, 4 }
  0xc3   : > { %1141 = vrot.lane.b32.xlu1 %v2989_v29, %s2310_s9  ;;  %v737_v12 = vsel %vm2427_vm4, %v735_v59, %v736_v5  ;;  %v634_v59 = vshll.u32 %v3054_v26, 16  ;;  %v1387_v5 = vsel %vm1369_vm9, %v1354_v0, %v2838_v13  ;;  %v3093_v0 = vrot.slane %v432_v58, 5 }
  0xc4   : > { %v3017_v14 = vpop.permute.xlu0 %1152  ;;  %v1420_v35 = vsel %vm1402_vm10, %v1387_v5, %v2936_v33 }
  0xc5   : > { %v3024_v44 = vpop.permute.xlu1 %1203  ;;  %v1453_v13 = vsel %vm1435_vm11, %v1420_v35, %v2964_v49  ;;  %v636_v27 = vrot.slane %v634_v59, 5  ;;  %v1317_v49 = vsel %vm1287_vm7, %v2407_v4, %v2902_v53 }
  0xc6   : > { %1123 = vrot.lane.b32.xlu0 %v2872_v25, %s2310_s9  ;;  %v1486_v33 = vsel %vm1468_vm12, %v1453_v13, %v2996_v28 }
  0xc7   : > { %1174 = vrot.lane.b32.xlu1 %v2889_v56, %s2311_s10  ;;  %v734_v56 = vsel %vm2427_vm4, %v2015_v15, %v733_v6  ;;  %v436_v6 = vshrl.u32 %v3047_v31, 16  ;;  %v631_v15 = vor.u32 %v630_v22, %v3049_v43  ;;  %v428_v22 = vrot.slane %v426_v38, 5 }
  0xc8   : > { %v3044_v25 = vpop.permute.xlu0 %1185  ;;  %v3074_v23 = vcombine.low %v734_v56, %v737_v12  ;;  %v3091_v56 = vld [vmem:[%s2395_s5 + $0x5c] sm:$0x1]  ;;  %v622_v12 = vrot.slane %v621_v30, 4  ;;  %v1338_v38 = vsel %vm1336_vm8, %v1290_v47, %v2874_v19  ;;  %v1356_v19 = vsel %vm1336_vm8, %v1317_v49, %v2868_v2 }
  0xc9   : > { %v1237_v24 = vpop.permute.xlu1 %1236  ;;  %v438_v7 = vrot.slane %v436_v6, 4  ;;  %v429_v28 = vor.u32 %v428_v22, %v425_v61  ;;  %v442_v58 = vshll.u32 %v3091_v56, 16  ;;  %v1371_v53 = vsel %vm1369_vm9, %v1338_v38, %v2854_v3 }
  0xca   : > { %1125 = vrot.lane.b32.xlu0 %v3029_v45, %s2310_s9  ;;  %v1519_v5 = vsel %vm1501_vm13, %v1486_v33, %v1237_v24  ;;  %v627_v30 = vsel %vm2472_vm5, %v622_v12, %v3049_v43  ;;  %v1389_v59 = vsel %vm1369_vm9, %v1356_v19, %v2922_v48  ;;  %v1404_v61 = vsel %vm1402_vm10, %v1371_v53, %v2959_v18 }
  0xcb   : > { %1176 = vrot.lane.b32.xlu1 %v3039_v34, %s2311_s10  ;;  %v439_v47 = vor.u32 %v438_v7, %v3093_v0  ;;  %v3126_v2 = vcombine.low %v3042_v17, %v3047_v31  ;;  %v1422_v3 = vsel %vm1402_vm10, %v1389_v59, %v2949_v8  ;;  %v1437_v43 = vsel %vm1435_vm11, %v1404_v61, %v2991_v63 }
  0xcc   : > { %v3068_v36 = vpop.permute.xlu0 %1187  ;;  %v430_v13 = vrot.slane %v429_v28, 4  ;;  %v444_v48 = vrot.slane %v442_v58, 5  ;;  %v1455_v18 = vsel %vm1435_vm11, %v1422_v3, %v2978_v46  ;;  %v1470_v7 = vsel %vm1468_vm12, %v1437_v43, %v3044_v25  ;;  %v246_v43 = vld [vmem:[%s2395_s5 + $0xc4] sm:$0xf] }
  0xcd   : > { %v1239_v54 = vpop.permute.xlu1 %1238  ;;  %v440_v8 = vrot.slane %v439_v47, 4  ;;  %v1293_v63 = vsel %vm1287_vm7, %v2412_v10, %v2887_v55  ;;  %v1488_v12 = vsel %vm1468_vm12, %v1455_v18, %v3024_v44  ;;  %v796_v46 = vrot.slane %v2999_v52, 5 }
  0xce   : > { %1158 = vrot.lane.b32.xlu0 %v2914_v11, %s2311_s10  ;;  %v632_v11 = vrot.slane %v631_v15, 4  ;;  %v1521_v25 = vsel %vm1501_vm13, %v1488_v12, %v1239_v54  ;;  %v1340_v55 = vsel %vm1336_vm8, %v1293_v63, %v2892_v60  ;;  %v435_v54 = vsel %vm2472_vm5, %v430_v13, %v3093_v0 }
  0xcf   : > { %1209 = vrot.lane.b32.xlu1 %v2955_v42, %s2312_s11  ;;  %v445_v52 = vsel %vm2472_vm5, %v440_v8, %v444_v48  ;;  %v1373_v44 = vsel %vm1369_vm9, %v1340_v55, %v2947_v39  ;;  %v798_v60 = vrot.slane %v796_v46, 4  ;;  %v815_v8 = vshrl.u32 %v246_v43, 16 }
  0xd0   : > { %v1221_v21 = vpop.permute.xlu0 %1220  ;;  %v637_v15 = vsel %vm2472_vm5, %v632_v11, %v636_v27  ;;  %v3181_v58 = vcombine.low %v435_v54, %v445_v52  ;;  %v811_v63 = vshll.u32 %v246_v43, 16 }
  0xd1   : > { %v1272_v35 = vpop.permute.xlu1 %1271  ;;  %v3142_v33 = vcombine.low %v627_v30, %v637_v15  ;;  %v1503_v11 = vsel %vm1501_vm13, %v1470_v7, %v1221_v21  ;;  %v743_v30 = vrot.slane %v3091_v56, 5  ;;  %v245_v56 = vld [vmem:[%s2395_s5 + $0xc0] sm:$0xf] }
  0xd2   : > { %1160 = vrot.lane.b32.xlu0 %v3074_v23, %s2311_s10  ;;  %v1552_v6 = vsel %vm1534_vm14, %v1519_v5, %v1272_v35  ;;  %v2024_v5 = vrot.slane %v2994_v62, 9  ;;  %v799_v35 = vrot.slane %v3054_v26, 5  ;;  %v740_v62 = vrot.slane %v3047_v31, 5 }
  0xd3   : > { %1211 = vrot.lane.b32.xlu1 %v3078_v57, %s2312_s11  ;;  %2149 = vmatprep.mubr.msk.bf16.mxu1 %vm1587_vm15, %v1552_v6  ;;  %v1406_v6 = vsel %vm1402_vm10, %v1373_v44, %v2971_v50  ;;  %v802_v18 = vshrl.u32 %v245_v56, 16  ;;  %v805_v7 = vshll.u32 %v245_v56, 16  ;;  %v2075_v44 = vcombine.low %v245_v56, %v246_v43 }
  0xd4   : > { %v1223_v24 = vpop.permute.xlu0 %1222  ;;  %v1439_v0 = vsel %vm1435_vm11, %v1406_v6, %v3017_v14  ;;  %v797_v47 = vsel %vm2427_vm4, %v2024_v5, %v796_v46  ;;  %v800_v14 = vsel %vm2427_vm4, %v798_v60, %v799_v35  ;;  %v813_v46 = vrot.slane %v811_v63, 5 }
  0xd5   : > { %v3128_v22 = vpop.permute.xlu1 %985  ;;  %v1472_v39 = vsel %vm1468_vm12, %v1439_v0, %v3068_v36  ;;  %v3201_v31 = vcombine.low %v797_v47, %v800_v14  ;;  %v2016_v36 = vrot.slane %v3042_v17, 9 }
  0xd6   : > { %1193 = vrot.lane.b32.xlu0 %v2984_v20, %s2312_s11  ;;  %v1505_v50 = vsel %vm1501_vm13, %v1472_v39, %v1223_v24  ;;  %v742_v24 = vrot.slane %v740_v62, 4 }
  0xd7   : > { %1244 = vrot.lane.b32.xlu1 %v2989_v29, %s2313_s14 }
  0xd8   : > { %v1256_v27 = vpop.permute.xlu0 %1255  ;;  %v744_v61 = vsel %vm2427_vm4, %v742_v24, %v743_v30  ;;  %v3276_v30 = vld [vmem:[%s2395_s5 + $0xcc] sm:$0xf] }
  0xd9   : > { %v1536_v38 = vsel %vm1534_vm14, %v1503_v11, %v1256_v27  ;;  %v1274_v49 = vpop.permute.xlu1 %1273  ;;  %v804_v11 = vrot.slane %v802_v18, 4  ;;  %v807_v27 = vrot.slane %v805_v7, 5 }
  0xda   : > { %1195 = vrot.lane.b32.xlu0 %v3126_v2, %s2312_s11  ;;  %2133 = vmatprep.mubr.msk.bf16.mxu0 %vm1587_vm15, %v1536_v38  ;;  %v1554_v10 = vsel %vm1534_vm14, %v1521_v25, %v1274_v49  ;;  %v817_v25 = vrot.slane %v815_v8, 4  ;;  %v247_v49 = vld [vmem:[%s2395_s5 + $0xc8] sm:$0x1] }
  0xdb   : > { %1246 = vrot.lane.b32.xlu1 %v3142_v33, %s2313_s14  ;;  %2150 = vmatmul.mubr.msk.bf16.vlgmr.msra.gmra.mrb[0].mxu1 %vm1587_vm15, %v1554_v10  ;;  %v808_v55 = vor.u32 %v807_v27, %v804_v11  ;;  %v833_v24 = vrot.slane %v247_v49, 5 }
  0xdc   : > { %v3169_v21 = vpop.permute.xlu0 %969  ;;  %v818_v54 = vor.u32 %v817_v25, %v813_v46 }
  0xdd   : > { %v3175_v28 = vpop.permute.xlu1 %987  ;;  %v809_v60 = vrot.slane %v808_v55, 4 }
  0xde   : > { %1228 = vrot.lane.b32.xlu0 %v3029_v45, %s2313_s14  ;;  %v819_v35 = vrot.slane %v818_v54, 4 }
  0xdf   : > { %1279 = vrot.lane.b32.xlu1 %v3039_v34, %s2314_s23 }
  0xe0   : > { %v1258_v26 = vpop.permute.xlu0 %1257 }
  0xe1   : > { %v1538_v19 = vsel %vm1534_vm14, %v1505_v50, %v1258_v26  ;;  %v3194_v53 = vpop.permute.xlu1 %1065  ;;  %v830_v50 = vrot.slane %v246_v43, 5  ;;  %v839_v43 = vshll.u32 %v3276_v30, 16 }
  0xe2   : > { %1230 = vrot.lane.b32.xlu0 %v3181_v58, %s2313_s14  ;;  %2134 = vmatmul.mubr.msk.bf16.vlgmr.msra.gmra.mrb[0].mxu0 %vm1587_vm15, %v1538_v19  ;;  %v2025_v19 = vrot.slane %v245_v56, 9 }
  0xe3   : > { %993 = vrot.lane.b32.xlu1 %v2989_v29, %s2309_s8  ;;  %v741_v29 = vsel %vm2427_vm4, %v2016_v36, %v740_v62  ;;  %v832_v36 = vrot.slane %v830_v50, 4  ;;  %v841_v25 = vrot.slane %v839_v43, 5 }
  0xe4   : > { %v3205_v15 = vpop.permute.xlu0 %971  ;;  %v3225_v13 = vcombine.low %v741_v29, %v744_v61  ;;  %v3279_v61 = vld [vmem:[%s2395_s5 + $0xd0] sm:$0xf]  ;;  %v831_v56 = vsel %vm2427_vm4, %v2025_v19, %v830_v50 }
  0xe5   : > { %v3207_v59 = vpop.permute.xlu1 %1067  ;;  %v834_v7 = vsel %vm2427_vm4, %v832_v36, %v833_v24  ;;  %v849_v8 = vshrl.u32 %v3279_v61, 16  ;;  %v845_v63 = vshll.u32 %v3279_v61, 16 }
  0xe6   : > { %1263 = vrot.lane.b32.xlu0 %v3074_v23, %s2314_s23  ;;  %v3299_v27 = vcombine.low %v831_v56, %v834_v7 }
  0xe7   : > { %1281 = vrot.lane.b32.xlu1 %v3201_v31, %s2314_s23  ;;  %v847_v55 = vrot.slane %v845_v63, 5  ;;  %v851_v54 = vrot.slane %v849_v8, 4 }
  0xe8   : > { %v3217_v17 = vpop.permute.xlu0 %1049 }
  0xe9   : > { %v3219_v3 = vpop.permute.xlu1 %1100 }
  0xea   : > { %977 = vrot.lane.b32.xlu0 %v3029_v45, %s2309_s8 }
  0xeb   : > { %995 = vrot.lane.b32.xlu1 %v3142_v33, %s2309_s8 }
  0xec   : > { %v3229_v48 = vpop.permute.xlu0 %1051 }
  0xed   : > { %v3231_v12 = vpop.permute.xlu1 %1102 }
  0xee   : > { %1265 = vrot.lane.b32.xlu0 %v3225_v13, %s2314_s23 }
  0xef   : > { %1073 = vrot.lane.b32.xlu1 %v3039_v34, %s2308_s7  ;;  %v821_v34 = vshll.u32 %v247_v49, 16 }
  0xf0   : > { %v3237_v45 = vpop.permute.xlu0 %1084 }
  0xf1   : > { %v3239_v38 = vpop.permute.xlu1 %1135  ;;  %v823_v6 = vrot.slane %v821_v34, 5 }
  0xf2   : > { %979 = vrot.lane.b32.xlu0 %v3181_v58, %s2309_s8 }
  0xf3   : > { %1075 = vrot.lane.b32.xlu1 %v3201_v31, %s2308_s7  ;;  %v824_v62 = vsel %vm2472_vm5, %v819_v35, %v823_v6 }
  0xf4   : > { %v3246_v10 = vpop.permute.xlu0 %1086 }
  0xf5   : > { %v3248_v52 = vpop.permute.xlu1 %1137 }
  0xf6   : > { %1057 = vrot.lane.b32.xlu0 %v3074_v23, %s2308_s7  ;;  %v814_v23 = vsel %vm2472_vm5, %v809_v60, %v813_v46  ;;  %v3302_v60 = vld [vmem:[%s2395_s5 + $0xd4] sm:$0x1] }
  0xf7   : > { %1108 = vrot.lane.b32.xlu1 %v3078_v57, %s2307_s6  ;;  %v3271_v47 = vcombine.low %v814_v23, %v824_v62  ;;  %v852_v23 = vor.u32 %v851_v54, %v847_v55  ;;  %v855_v62 = vshll.u32 %v3302_v60, 16  ;;  %v867_v54 = vrot.slane %v3302_v60, 5 }
  0xf8   : > { %v3254_v5 = vpop.permute.xlu0 %1119 }
  0xf9   : > { %v1171_v0 = vpop.permute.xlu1 %1170  ;;  %v853_v43 = vrot.slane %v852_v23, 4 }
  0xfa   : > { %1059 = vrot.lane.b32.xlu0 %v3225_v13, %s2308_s7 }
  0xfb   : > { %1110 = vrot.lane.b32.xlu1 %v2075_v44, %s2307_s6 }
  0xfc   : > { %v3259_v39 = vpop.permute.xlu0 %1121 }
  0xfd   : > { %v3265_v26 = vpop.permute.xlu1 %1172 }
  0xfe   : > { %1092 = vrot.lane.b32.xlu0 %v3126_v2, %s2307_s6 }
  0xff   : > { %1143 = vrot.lane.b32.xlu1 %v3142_v33, %s2310_s9  ;;  %v836_v33 = vshrl.u32 %v3276_v30, 16 }
 0x100   : > { %v3273_v14 = vpop.permute.xlu0 %1154 }
 0x101   : > { %v1206_v29 = vpop.permute.xlu1 %1205  ;;  %v838_v46 = vrot.slane %v836_v33, 4 }
 0x102   : > { %1094 = vrot.lane.b32.xlu0 %v3003_v40, %s2307_s6 }
 0x103   : > { %1145 = vrot.lane.b32.xlu1 %v3271_v47, %s2310_s9 }
 0x104   : > { %v3287_v18 = vpop.permute.xlu0 %1156 }
 0x105   : > { %v1208_v11 = vpop.permute.xlu1 %1207 }
 0x106   : > { %1127 = vrot.lane.b32.xlu0 %v3181_v58, %s2310_s9  ;;  %v1320_v58 = vsel %vm1287_vm7, %v2548_v9, %v3128_v22  ;;  %v2078_v22 = vcombine.low %v3276_v30, %v3279_v61 }
 0x107   : > { %1178 = vrot.lane.b32.xlu1 %v3201_v31, %s2311_s10  ;;  %v842_v31 = vor.u32 %v841_v25, %v838_v46  ;;  %v1358_v35 = vsel %vm1336_vm8, %v1320_v58, %v3194_v53 }
 0x108   : > { %v1190_v49 = vpop.permute.xlu0 %1189  ;;  %v1391_v50 = vsel %vm1369_vm9, %v1358_v35, %v3219_v3  ;;  %v857_v3 = vrot.slane %v855_v62, 5 }
 0x109   : > { %v1241_v34 = vpop.permute.xlu1 %1240  ;;  %v1424_v36 = vsel %vm1402_vm10, %v1391_v50, %v3239_v38  ;;  %v843_v53 = vrot.slane %v842_v31, 4 }
 0x10a   : > { %1129 = vrot.lane.b32.xlu0 %v2560_v1, %s2310_s9  ;;  %v1457_v9 = vsel %vm1435_vm11, %v1424_v36, %v1171_v0  ;;  %v3682_v36 = vld [vmem:[#allocation5_spill] sm:$0xff]  ;;  %s2007_s9 = sshll.u32 %s188_s29, 8 }
 0x10b   : > { %1180 = vrot.lane.b32.xlu1 %v3299_v27, %s2311_s10  ;;  %v1490_v24 = vsel %vm1468_vm12, %v1457_v9, %v1206_v29  ;;  %v848_v29 = vsel %vm2472_vm5, %v843_v53, %v847_v55 }
 0x10c   : > { %v3313_v6 = vpop.permute.xlu0 %1191  ;;  %v1523_v56 = vsel %vm1501_vm13, %v1490_v24, %v1241_v34 }
 0x10d   : > { %v1243_v19 = vpop.permute.xlu1 %1242 }
 0x10e   : > { %1162 = vrot.lane.b32.xlu0 %v3225_v13, %s2311_s10  ;;  %v1296_v13 = vsel %vm1287_vm7, %v2567_v37, %v3169_v21 }
 0x10f   : > { %1213 = vrot.lane.b32.xlu1 %v2075_v44, %s2312_s11  ;;  %v1323_v44 = vsel %vm1287_vm7, %v2639_v32, %v3175_v28  ;;  %v1342_v0 = vsel %vm1336_vm8, %v1296_v13, %v3217_v17  ;;  %v858_v32 = vsel %vm2472_vm5, %v853_v43, %v857_v3  ;;  %v864_v28 = vrot.slane %v3279_v61, 5 }
 0x110   : > { %v1225_v33 = vpop.permute.xlu0 %1224  ;;  %v1360_v37 = vsel %vm1336_vm8, %v1323_v44, %v3207_v59  ;;  %v1375_v21 = vsel %vm1369_vm9, %v1342_v0, %v3237_v45 }
 0x111   : > { %v1276_v7 = vpop.permute.xlu1 %1275  ;;  %v1393_v17 = vsel %vm1369_vm9, %v1360_v37, %v3231_v12  ;;  %v1408_v63 = vsel %vm1402_vm10, %v1375_v21, %v3254_v5  ;;  %v2079_v12 = vcombine.low %v848_v29, %v858_v32  ;;  %v2026_v5 = vrot.slane %v3276_v30, 9  ;;  %v3683_v21 = vld [vmem:[#allocation8_spill] sm:$0xff] }
 0x112   : > { %1164 = vrot.lane.b32.xlu0 %v2458_v41, %s2311_s10  ;;  %v1556_v38 = vsel %vm1534_vm14, %v1523_v56, %v1276_v7  ;;  %v1426_v59 = vsel %vm1402_vm10, %v1393_v17, %v3248_v52  ;;  %v1441_v45 = vsel %vm1435_vm11, %v1408_v63, %v3273_v14  ;;  %v866_v14 = vrot.slane %v864_v28, 4  ;;  %s3512_s10 = scalar_lea.vmem [#allocation2], %s2007_s9 }
 0x113   : > { %1215 = vrot.lane.b32.xlu1 %v2078_v22, %s2312_s11  ;;  %2153 = vmatprep.mubr.msk.bf16.mxu1 %vm1587_vm15, %v1556_v38  ;;  %v1459_v51 = vsel %vm1435_vm11, %v1426_v59, %v3265_v26  ;;  %v1474_v61 = vsel %vm1468_vm12, %v1441_v45, %v1190_v49  ;;  %v3680_v49 = vld [vmem:[#allocation7_spill] sm:$0xff]  ;;  %s1941_s12 = sshll.u32 %s3512_s10, 4  ;;  %s3607_s12 = int_to_ptr.vmem [resolvable:$true] %s1941_s12 }
 0x114   : > { %v1227_v8 = vpop.permute.xlu0 %1226  ;;  %v1492_v25 = vsel %vm1468_vm12, %v1459_v51, %v1208_v11  ;;  %v1507_v52 = vsel %vm1501_vm13, %v1474_v61, %v1225_v33  ;;  %s2243_s22 = scalar_lea.vmem %s3607_s12, 4096 }
 0x115   : > { %v3354_v46 = vpop.permute.xlu1 %989  ;;  %p2244_p11 = scmp.ne.s32.totalorder %s3607_s12, %s2243_s22 }
 0x116   : > { %1197 = vrot.lane.b32.xlu0 %v3003_v40, %s2312_s11  ;;  %v1525_v40 = vsel %vm1501_vm13, %v1492_v25, %v1243_v19  ;;  %v3681_v19 = vld [vmem:[#allocation6_spill] sm:$0xff]  ;;  %v3684_v25 = vld [vmem:[#allocation9_spill] sm:$0xff] }
 0x117   : > { %1248 = vrot.lane.b32.xlu1 %v3271_v47, %s2313_s14  ;;  %v1299_v47 = vsel %vm1287_vm7, %v3680_v49, %v3205_v15  ;;  %v865_v15 = vsel %vm2427_vm4, %v2026_v5, %v864_v28  ;;  %p2245_p12 = pnand %p2244_p11, %p2380_p5 }
 0x118   : > { %v1260_v55 = vpop.permute.xlu0 %1259  ;;  %v1344_v11 = vsel %vm1336_vm8, %v1299_v47, %v3229_v48 }
 0x119   : > { %v1540_v26 = vsel %vm1534_vm14, %v1507_v52, %v1260_v55  ;;  %v1278_v34 = vpop.permute.xlu1 %1277  ;;  %v1377_v60 = vsel %vm1369_vm9, %v1344_v11, %v3246_v10  ;;  %v3685_v55 = vld [vmem:[#allocation10_spill] sm:$0xff]  ;;  %p2246_p13 = pneg %p2245_p12 }
 0x11a   : > { %1199 = vrot.lane.b32.xlu0 %v2407_v4, %s2312_s11  ;;  %2137 = vmatprep.mubr.msk.bf16.mxu0 %vm1587_vm15, %v1540_v26  ;;  %v1558_v30 = vsel %vm1534_vm14, %v1525_v40, %v1278_v34  ;;  %v868_v4 = vsel %vm2427_vm4, %v866_v14, %v867_v54  ;;  %v1410_v31 = vsel %vm1402_vm10, %v1377_v60, %v3259_v39  ;;  %s2107_s11 = sshll.u32 %s2363_s19, 12  ;;  %s3613_s19 = scalar_lea.sflag [#allocation3], %s188_s29 }
 0x11b   : > { %1250 = vrot.lane.b32.xlu1 %v2079_v12, %s2313_s14  ;;  %2154 = vmatmul.mubr.msk.bf16.gmra.mrb[4].mxu1 %vm1587_vm15, %v1558_v30  ;;  %v1443_v48 = vsel %vm1435_vm11, %v1410_v31, %v3287_v18  ;;  %v2080_v23 = vcombine.low %v865_v15, %v868_v4  ;;  %s3604_s20 = scalar_lea.hbm %s3659_s4, %s2107_s11 }
 0x11c   : > { %v974_v58 = vpop.permute.xlu0 %973  ;;  %v1476_v10 = vsel %vm1468_vm12, %v1443_v48, %v3313_v6 }
 0x11d   : > { %v992_v35 = vpop.permute.xlu1 %991  ;;  %v1509_v16 = vsel %vm1501_vm13, %v1476_v10, %v1227_v8  ;;  %v1326_v8 = vsel %vm1287_vm7, %v3683_v21, %v3354_v46  ;;  %v1302_v52 = vsel %vm1287_vm7, %v3684_v25, %v974_v58 }
 0x11e   : > { %1232 = vrot.lane.b32.xlu0 %v2560_v1, %s2313_s14  ;;  %v1329_v14 = vsel %vm1287_vm7, %v3685_v55, %v992_v35 }
 0x11f   : > { %1283 = vrot.lane.b32.xlu1 %v3299_v27, %s2314_s23 }
 0x120   : > { %v1262_v62 = vpop.permute.xlu0 %1261 }
 0x121   : > { %v1542_v50 = vsel %vm1534_vm14, %v1509_v16, %v1262_v62  ;;  %v1070_v39 = vpop.permute.xlu1 %1069  ;;  %v3686_v16 = vld [vmem:[#allocation11_spill] sm:$0xff] }
 0x122   : > { %1234 = vrot.lane.b32.xlu0 %v3681_v19, %s2313_s14  ;;  %2138 = vmatmul.mubr.msk.bf16.gmra.mrb[4].mxu0 %vm1587_vm15, %v1542_v50  ;;  %v1362_v32 = vsel %vm1336_vm8, %v1326_v8, %v1070_v39 }
 0x123   : > { %1285 = vrot.lane.b32.xlu1 %v2080_v23, %s2314_s23 }
 0x124   : > { %v976_v1 = vpop.permute.xlu0 %975 }
 0x125   : > { %v1072_v18 = vpop.permute.xlu1 %1071  ;;  %v1305_v62 = vsel %vm1287_vm7, %v3686_v16, %v976_v1 }
 0x126   : > { %1267 = vrot.lane.b32.xlu0 %v2458_v41, %s2314_s23  ;;  %v1364_v40 = vsel %vm1336_vm8, %v1329_v14, %v1072_v18 }
 0x128   : > { %v1054_v27 = vpop.permute.xlu0 %1053 }
 0x129   : > { %v1105_v6 = vpop.permute.xlu1 %1104  ;;  %v1346_v54 = vsel %vm1336_vm8, %v1302_v52, %v1054_v27 }
 0x12a   : > { %1269 = vrot.lane.b32.xlu0 %v3682_v36, %s2314_s23  ;;  %v1395_v17 = vsel %vm1369_vm9, %v1362_v32, %v1105_v6  ;;  %s2315_s23 = smov [#allocation2]  }
 0x12b   : > { %s2247_s27 = sshll.u32 %s2315_s23, 4  ;;  %s2248_s27 = int_to_ptr.vmem [resolvable:$false] %s2247_s27 }
 0x12c   : > { %v1056_v9 = vpop.permute.xlu0 %1055  ;;  %s2249_s28 = scalar_lea.vmem %s2248_s27, 8192  ;;  %p2250_p0 = scmp.lt.s32.totalorder %s3607_s12, %s2248_s27 }
 0x12d   : > { %v1107_v22 = vpop.permute.xlu1 %1106  ;;  %v1348_v39 = vsel %vm1336_vm8, %v1305_v62, %v1056_v9  ;;  %p2251_p1 = scmp.lt.s32.totalorder %s2249_s28, %s2243_s22 }
 0x12e   : > { %v1397_v49 = vsel %vm1369_vm9, %v1364_v40, %v1107_v22 }
 0x12f   : > { %p2252_p2 = por %p2251_p1, %p2250_p0 }
 0x130   : > { %v1089_v53 = vpop.permute.xlu0 %1088 }
 0x131   : > { %v1140_v24 = vpop.permute.xlu1 %1139  ;;  %v1379_v26 = vsel %vm1369_vm9, %v1346_v54, %v1089_v53  ;;  %p2253_p3 = pnand %p2252_p2, %p2246_p13 }
 0x132   : > { %v1428_v59 = vsel %vm1402_vm10, %v1395_v17, %v1140_v24 }
 0x134   : > { %v1091_v33 = vpop.permute.xlu0 %1090 }
 0x135   : > { %v1142_v43 = vpop.permute.xlu1 %1141  ;;  %v1381_v19 = vsel %vm1369_vm9, %v1348_v39, %v1091_v33 }
 0x136   : > { %v1430_v11 = vsel %vm1402_vm10, %v1397_v49, %v1142_v43 }
 0x138   : > { %v1124_v3 = vpop.permute.xlu0 %1123 }
 0x139   : > { %v1175_v56 = vpop.permute.xlu1 %1174  ;;  %v1412_v47 = vsel %vm1402_vm10, %v1379_v26, %v1124_v3 }
 0x13a   : > { %v1461_v45 = vsel %vm1435_vm11, %v1428_v59, %v1175_v56 }
 0x13c   : > { %v1126_v7 = vpop.permute.xlu0 %1125 }
 0x13d   : > { %v1177_v13 = vpop.permute.xlu1 %1176  ;;  %v1414_v27 = vsel %vm1402_vm10, %v1381_v19, %v1126_v7 }
 0x13e   : > { %v1463_v58 = vsel %vm1435_vm11, %v1430_v11, %v1177_v13 }
 0x140   : > { %v1159_v38 = vpop.permute.xlu0 %1158 }
 0x141   : > { %v1210_v44 = vpop.permute.xlu1 %1209  ;;  %v1445_v60 = vsel %vm1435_vm11, %v1412_v47, %v1159_v38 }
 0x142   : > { %v1494_v51 = vsel %vm1468_vm12, %v1461_v45, %v1210_v44 }
 0x144   : > { %v1161_v0 = vpop.permute.xlu0 %1160 }
 0x145   : > { %v1212_v29 = vpop.permute.xlu1 %1211  ;;  %v1447_v36 = vsel %vm1435_vm11, %v1414_v27, %v1161_v0 }
 0x146   : > { %v1496_v4 = vsel %vm1468_vm12, %v1463_v58, %v1212_v29 }
 0x148   : > { %v1194_v41 = vpop.permute.xlu0 %1193 }
 0x149   : > { %v1245_v37 = vpop.permute.xlu1 %1244  ;;  %v1478_v15 = vsel %vm1468_vm12, %v1445_v60, %v1194_v41 }
 0x14a   : > { %v1527_v12 = vsel %vm1501_vm13, %v1494_v51, %v1245_v37 }
 0x14c   : > { %v1196_v28 = vpop.permute.xlu0 %1195 }
 0x14d   : > { %v1247_v63 = vpop.permute.xlu1 %1246  ;;  %v1480_v22 = vsel %vm1468_vm12, %v1447_v36, %v1196_v28 }
 0x14e   : > { %v1529_v48 = vsel %vm1501_vm13, %v1496_v4, %v1247_v63 }
 0x150   : > { %v1229_v61 = vpop.permute.xlu0 %1228 }
 0x151   : > { %v1280_v5 = vpop.permute.xlu1 %1279  ;;  %v1511_v31 = vsel %vm1501_vm13, %v1478_v15, %v1229_v61 }
 0x152   : > { %v1560_v46 = vsel %vm1534_vm14, %v1527_v12, %v1280_v5 }
 0x153   : > { %2157 = vmatprep.mubr.msk.bf16.mxu1 %vm1587_vm15, %v1560_v46 }
 0x154   : > { %v1231_v34 = vpop.permute.xlu0 %1230 }
 0x155   : > { %v994_v30 = vpop.permute.xlu1 %993  ;;  %v1513_v1 = vsel %vm1501_vm13, %v1480_v22, %v1231_v34 }
 0x156   : > { %v1332_v51 = vsel %vm1287_vm7, %v2955_v42, %v994_v30 }
 0x158   : > { %v1264_v35 = vpop.permute.xlu0 %1263 }
 0x159   : > { %v1544_v10 = vsel %vm1534_vm14, %v1511_v31, %v1264_v35  ;;  %v1282_v23 = vpop.permute.xlu1 %1281 }
 0x15a   : > { %2141 = vmatprep.mubr.msk.bf16.mxu0 %vm1587_vm15, %v1544_v10  ;;  %v1562_v50 = vsel %vm1534_vm14, %v1529_v48, %v1282_v23 }
 0x15b   : > { %2158 = vmatmul.mubr.msk.bf16.gmra.mrb[8].mxu1 %vm1587_vm15, %v1562_v50 }
 0x15c   : > { %v978_v18 = vpop.permute.xlu0 %977 }
 0x15d   : > { %v996_v6 = vpop.permute.xlu1 %995  ;;  %v1308_v49 = vsel %vm1287_vm7, %v2984_v20, %v978_v18 }
 0x15e   : > { %v1335_v46 = vsel %vm1287_vm7, %v3078_v57, %v996_v6 }
 0x160   : > { %v1266_v53 = vpop.permute.xlu0 %1265 }
 0x161   : > { %v1546_v24 = vsel %vm1534_vm14, %v1513_v1, %v1266_v53  ;;  %v1074_v43 = vpop.permute.xlu1 %1073  ;;  %v3495_v1 = vld [vmem:[%s3657_s2] ss:$0 sm:$0xff] }
 0x162   : > { %2142 = vmatmul.mubr.msk.bf16.gmra.mrb[8].mxu0 %vm1587_vm15, %v1546_v24  ;;  %v1366_v61 = vsel %vm1336_vm8, %v1332_v51, %v1074_v43  ;;  %v3500_v53 = vld [vmem:[%s3658_s3] ss:$0 sm:$0xff] }
 0x164   : > { %v980_v9 = vpop.permute.xlu0 %979 }
 0x165   : > { %v1076_v3 = vpop.permute.xlu1 %1075  ;;  %v1311_v35 = vsel %vm1287_vm7, %v3126_v2, %v980_v9 }
 0x166   : > { %v1368_v14 = vsel %vm1336_vm8, %v1335_v46, %v1076_v3 }
 0x168   : > { %v1058_v56 = vpop.permute.xlu0 %1057 }
 0x169   : > { %v1109_v33 = vpop.permute.xlu1 %1108  ;;  %v1350_v57 = vsel %vm1336_vm8, %v1308_v49, %v1058_v56 }
 0x16a   : > { %v1399_v5 = vsel %vm1369_vm9, %v1366_v61, %v1109_v33 }
 0x16c   : > { %v1060_v13 = vpop.permute.xlu0 %1059 }
 0x16d   : > { %v1111_v38 = vpop.permute.xlu1 %1110  ;;  %v1352_v23 = vsel %vm1336_vm8, %v1311_v35, %v1060_v13 }
 0x16e   : > { %v1401_v42 = vsel %vm1369_vm9, %v1368_v14, %v1111_v38 }
 0x170   : > { %v1093_v7 = vpop.permute.xlu0 %1092 }
 0x171   : > { %v1144_v44 = vpop.permute.xlu1 %1143  ;;  %v1383_v60 = vsel %vm1369_vm9, %v1350_v57, %v1093_v7 }
 0x172   : > { %v1432_v52 = vsel %vm1402_vm10, %v1399_v5, %v1144_v44 }
 0x174   : > { %v1095_v29 = vpop.permute.xlu0 %1094 }
 0x175   : > { %v1146_v0 = vpop.permute.xlu1 %1145  ;;  %v1385_v62 = vsel %vm1369_vm9, %v1352_v23, %v1095_v29 }
 0x176   : > { %v1434_v47 = vsel %vm1402_vm10, %v1401_v42, %v1146_v0 }
 0x178   : > { %v1128_v41 = vpop.permute.xlu0 %1127 }
 0x179   : > { %v1179_v37 = vpop.permute.xlu1 %1178  ;;  %v1416_v4 = vsel %vm1402_vm10, %v1383_v60, %v1128_v41 }
 0x17a   : > { %v1465_v55 = vsel %vm1435_vm11, %v1432_v52, %v1179_v37 }
 0x17c   : > { %v1130_v21 = vpop.permute.xlu0 %1129 }
 0x17d   : > { %v1181_v8 = vpop.permute.xlu1 %1180  ;;  %v1418_v19 = vsel %vm1402_vm10, %v1385_v62, %v1130_v21 }
 0x17e   : > { %v1467_v11 = vsel %vm1435_vm11, %v1434_v47, %v1181_v8 }
 0x180   : > { %v1163_v32 = vpop.permute.xlu0 %1162 }
 0x181   : > { %v1214_v28 = vpop.permute.xlu1 %1213  ;;  %v1449_v48 = vsel %vm1435_vm11, %v1416_v4, %v1163_v32 }
 0x182   : > { %v1498_v54 = vsel %vm1468_vm12, %v1465_v55, %v1214_v28 }
 0x184   : > { %v1165_v17 = vpop.permute.xlu0 %1164 }
 0x185   : > { %v1216_v63 = vpop.permute.xlu1 %1215  ;;  %v1451_v18 = vsel %vm1435_vm11, %v1418_v19, %v1165_v17 }
 0x186   : > { %v1500_v58 = vsel %vm1468_vm12, %v1467_v11, %v1216_v63 }
 0x188   : > { %v1198_v59 = vpop.permute.xlu0 %1197 }
 0x189   : > { %v1249_v45 = vpop.permute.xlu1 %1248  ;;  %v1482_v16 = vsel %vm1468_vm12, %v1449_v48, %v1198_v59 }
 0x18a   : > { %v1531_v26 = vsel %vm1501_vm13, %v1498_v54, %v1249_v45 }
 0x18c   : > { %v1200_v12 = vpop.permute.xlu0 %1199 }
 0x18d   : > { %v1251_v25 = vpop.permute.xlu1 %1250  ;;  %v1484_v27 = vsel %vm1468_vm12, %v1451_v18, %v1200_v12 }
 0x18e   : > { %v1533_v31 = vsel %vm1501_vm13, %v1500_v58, %v1251_v25 }
 0x190   : > { %v1233_v40 = vpop.permute.xlu0 %1232 }
 0x191   : > { %v1284_v34 = vpop.permute.xlu1 %1283  ;;  %v1515_v50 = vsel %vm1501_vm13, %v1482_v16, %v1233_v40 }
 0x192   : > { %v1564_v30 = vsel %vm1534_vm14, %v1531_v26, %v1284_v34 }
 0x193   : > { %2161 = vmatprep.mubr.msk.bf16.mxu1 %vm1587_vm15, %v1564_v30 }
 0x194   : > { %v1235_v15 = vpop.permute.xlu0 %1234 }
 0x195   : > { %v1286_v20 = vpop.permute.xlu1 %1285  ;;  %v1517_v6 = vsel %vm1501_vm13, %v1484_v27, %v1235_v15 }
 0x196   : > { %v1566_v10 = vsel %vm1534_vm14, %v1533_v31, %v1286_v20 }
 0x197   : > { %2162 = vmatmul.mubr.msk.bf16.gmra.mrb[12].mxu1 %vm1587_vm15, %v1566_v10 }
 0x198   : > { %v1268_v39 = vpop.permute.xlu0 %1267 }
 0x199   : > { %v1548_v2 = vsel %vm1534_vm14, %v1515_v50, %v1268_v39 }
 0x19a   : > { %2145 = vmatprep.mubr.msk.bf16.mxu0 %vm1587_vm15, %v1548_v2 }
 0x19c   : > { %v1270_v36 = vpop.permute.xlu0 %1269 }
 0x19d   : > { %v1550_v22 = vsel %vm1534_vm14, %v1517_v6, %v1270_v36 }
 0x19e   : > { %2146 = vmatmul.mubr.msk.bf16.gmra.mrb[12].mxu0 %vm1587_vm15, %v1550_v22 }
 0x1ae   : > { %v2151_v24 = vpop.f32.mrb[0].mxu1 }
 0x1af   : > { %v1810_v43 = vmul.f32 %v2151_v24, %v3495_v1  ;;  %v1722_v9 = vpop.f32.mrb[1].mxu1 }
 0x1b0   : > { %v1808_v3 = vmul.f32 %v3495_v1, %v1722_v9  ;;  %v2152_v56 = vpop.f32.mrb[2].mxu1 }
 0x1b1   : > { %v1849_v33 = vadd.f32 %v3500_v53, %v1810_v43  ;;  %v1811_v13 = vmul.f32 %v2152_v56, %v3495_v1  ;;  %v1725_v38 = vpop.f32.mrb[3].mxu1 }
 0x1b2   : > { %v1847_v7 = vadd.f32 %v3500_v53, %v1808_v3  ;;  %v1809_v44 = vmul.f32 %v3495_v1, %v1725_v38 }
 0x1b3   : > { %v1881_v29 = vmax.f32 %v1849_v33, 0.0  ;;  %v1850_v0 = vadd.f32 %v3500_v53, %v1811_v13 }
 0x1b4   : > { %v1879_v41 = vmax.f32 %v1847_v7, 0.0  ;;  %v1848_v37 = vadd.f32 %v3500_v53, %v1809_v44 }
 0x1b5   : > { %v2135_v21 = vpop.f32.mrb[0].mxu0  ;;  %1913 = vst [vmem:[%s3512_s10 + $0x90] sm:$0xff] %v1881_v29  ;;  %v1882_v8 = vmax.f32 %v1850_v0, 0.0 }
 0x1b6   : > { %v1794_v32 = vmul.f32 %v2135_v21, %v3495_v1  ;;  %v1658_v28 = vpop.f32.mrb[1].mxu0  ;;  %1911 = vst [vmem:[%s3512_s10 + $0x80] sm:$0xff] %v1879_v41  ;;  %v1880_v17 = vmax.f32 %v1848_v37, 0.0 }
 0x1b7   : > { %v1792_v63 = vmul.f32 %v3495_v1, %v1658_v28  ;;  %v2136_v59 = vpop.f32.mrb[2].mxu0  ;;  %1914 = vst [vmem:[%s3512_s10 + $0x98] sm:$0xff] %v1882_v8 }
 0x1b8   : > { %v1833_v45 = vadd.f32 %v3500_v53, %v1794_v32  ;;  %v1795_v51 = vmul.f32 %v2136_v59, %v3495_v1  ;;  %v1661_v61 = vpop.f32.mrb[3].mxu0  ;;  %1912 = vst [vmem:[%s3512_s10 + $0x88] sm:$0xff] %v1880_v17 }
 0x1b9   : > { %v1831_v12 = vadd.f32 %v3500_v53, %v1792_v63  ;;  %v1793_v5 = vmul.f32 %v3495_v1, %v1661_v61 }
 0x1ba   : > { %v1865_v25 = vmax.f32 %v1833_v45, 0.0  ;;  %v1834_v52 = vadd.f32 %v3500_v53, %v1795_v51 }
 0x1bb   : > { %v1863_v46 = vmax.f32 %v1831_v12, 0.0  ;;  %v1832_v55 = vadd.f32 %v3500_v53, %v1793_v5 }
 0x1bc   : > { %1897 = vst [vmem:[%s3512_s10 + $0x10] sm:$0xff] %v1865_v25  ;;  %v1866_v14 = vmax.f32 %v1834_v52, 0.0 }
 0x1bd   : > { %1895 = vst [vmem:[%s3512_s10] sm:$0xff] %v1863_v46  ;;  %v1864_v54 = vmax.f32 %v1832_v55, 0.0 }
 0x1be   : > { %1898 = vst [vmem:[%s3512_s10 + $0x18] sm:$0xff] %v1866_v14 }
 0x1bf   : > { %1896 = vst [vmem:[%s3512_s10 + $0x8] sm:$0xff] %v1864_v54 }
 0x1ee   : > { %v2155_v40 = vpop.f32.mrb[4].mxu1 }
 0x1ef   : > { %v1814_v42 = vmul.f32 %v2155_v40, %v3495_v1  ;;  %v1738_v26 = vpop.f32.mrb[5].mxu1 }
 0x1f0   : > { %v1812_v34 = vmul.f32 %v3495_v1, %v1738_v26  ;;  %v2156_v49 = vpop.f32.mrb[6].mxu1 }
 0x1f1   : > { %v1853_v47 = vadd.f32 %v3500_v53, %v1814_v42  ;;  %v1815_v30 = vmul.f32 %v2156_v49, %v3495_v1  ;;  %v1741_v57 = vpop.f32.mrb[7].mxu1 }
 0x1f2   : > { %v1851_v11 = vadd.f32 %v3500_v53, %v1812_v34  ;;  %v1813_v60 = vmul.f32 %v3495_v1, %v1741_v57 }
 0x1f3   : > { %v1885_v58 = vmax.f32 %v1853_v47, 0.0  ;;  %v1854_v15 = vadd.f32 %v3500_v53, %v1815_v30 }
 0x1f4   : > { %v1883_v4 = vmax.f32 %v1851_v11, 0.0  ;;  %v1852_v31 = vadd.f32 %v3500_v53, %v1813_v60 }
 0x1f5   : > { %v2139_v20 = vpop.f32.mrb[4].mxu0  ;;  %1917 = vst [vmem:[%s3512_s10 + $0xb0] sm:$0xff] %v1885_v58  ;;  %v1886_v35 = vmax.f32 %v1854_v15, 0.0 }
 0x1f6   : > { %v1798_v48 = vmul.f32 %v2139_v20, %v3495_v1  ;;  %v1674_v10 = vpop.f32.mrb[5].mxu0  ;;  %1915 = vst [vmem:[%s3512_s10 + $0xa0] sm:$0xff] %v1883_v4  ;;  %v1884_v23 = vmax.f32 %v1852_v31, 0.0 }
 0x1f7   : > { %v1796_v16 = vmul.f32 %v3495_v1, %v1674_v10  ;;  %v2140_v62 = vpop.f32.mrb[6].mxu0  ;;  %1918 = vst [vmem:[%s3512_s10 + $0xb8] sm:$0xff] %v1886_v35 }
 0x1f8   : > { %v1837_v50 = vadd.f32 %v3500_v53, %v1798_v48  ;;  %v1799_v39 = vmul.f32 %v2140_v62, %v3495_v1  ;;  %v1677_v19 = vpop.f32.mrb[7].mxu0  ;;  %1916 = vst [vmem:[%s3512_s10 + $0xa8] sm:$0xff] %v1884_v23 }
 0x1f9   : > { %v1835_v2 = vadd.f32 %v3500_v53, %v1796_v16  ;;  %v1797_v18 = vmul.f32 %v3495_v1, %v1677_v19 }
 0x1fa   : > { %v1869_v27 = vmax.f32 %v1837_v50, 0.0  ;;  %v1838_v6 = vadd.f32 %v3500_v53, %v1799_v39 }
 0x1fb   : > { %v1867_v36 = vmax.f32 %v1835_v2, 0.0  ;;  %v1836_v22 = vadd.f32 %v3500_v53, %v1797_v18 }
 0x1fc   : > { %1901 = vst [vmem:[%s3512_s10 + $0x30] sm:$0xff] %v1869_v27  ;;  %v1870_v24 = vmax.f32 %v1838_v6, 0.0 }
 0x1fd   : > { %1899 = vst [vmem:[%s3512_s10 + $0x20] sm:$0xff] %v1867_v36  ;;  %v1868_v43 = vmax.f32 %v1836_v22, 0.0 }
 0x1fe   : > { %1902 = vst [vmem:[%s3512_s10 + $0x38] sm:$0xff] %v1870_v24 }
 0x1ff   : > { %1900 = vst [vmem:[%s3512_s10 + $0x28] sm:$0xff] %v1868_v43 }
 0x22e   : > { %v2159_v9 = vpop.f32.mrb[8].mxu1 }
 0x22f   : > { %v1818_v3 = vmul.f32 %v2159_v9, %v3495_v1  ;;  %v1754_v56 = vpop.f32.mrb[9].mxu1 }
 0x230   : > { %v1816_v33 = vmul.f32 %v3495_v1, %v1754_v56  ;;  %v2160_v13 = vpop.f32.mrb[10].mxu1 }
 0x231   : > { %v1857_v38 = vadd.f32 %v3500_v53, %v1818_v3  ;;  %v1819_v7 = vmul.f32 %v2160_v13, %v3495_v1  ;;  %v1757_v44 = vpop.f32.mrb[11].mxu1 }
 0x232   : > { %v1855_v29 = vadd.f32 %v3500_v53, %v1816_v33  ;;  %v1817_v0 = vmul.f32 %v3495_v1, %v1757_v44 }
 0x233   : > { %v1889_v41 = vmax.f32 %v1857_v38, 0.0  ;;  %v1858_v37 = vadd.f32 %v3500_v53, %v1819_v7 }
 0x234   : > { %v1887_v21 = vmax.f32 %v1855_v29, 0.0  ;;  %v1856_v8 = vadd.f32 %v3500_v53, %v1817_v0 }
 0x235   : > { %v2143_v32 = vpop.f32.mrb[8].mxu0  ;;  %1921 = vst [vmem:[%s3512_s10 + $0xd0] sm:$0xff] %v1889_v41  ;;  %v1890_v28 = vmax.f32 %v1858_v37, 0.0 }
 0x236   : > { %v1802_v17 = vmul.f32 %v2143_v32, %v3495_v1  ;;  %v1690_v63 = vpop.f32.mrb[9].mxu0  ;;  %1919 = vst [vmem:[%s3512_s10 + $0xc0] sm:$0xff] %v1887_v21  ;;  %v1888_v59 = vmax.f32 %v1856_v8, 0.0 }
 0x237   : > { %v1800_v45 = vmul.f32 %v3495_v1, %v1690_v63  ;;  %v2144_v51 = vpop.f32.mrb[10].mxu0  ;;  %1922 = vst [vmem:[%s3512_s10 + $0xd8] sm:$0xff] %v1890_v28 }
 0x238   : > { %v1841_v61 = vadd.f32 %v3500_v53, %v1802_v17  ;;  %v1803_v12 = vmul.f32 %v2144_v51, %v3495_v1  ;;  %v1693_v5 = vpop.f32.mrb[11].mxu0  ;;  %1920 = vst [vmem:[%s3512_s10 + $0xc8] sm:$0xff] %v1888_v59 }
 0x239   : > { %v1839_v25 = vadd.f32 %v3500_v53, %v1800_v45  ;;  %v1801_v52 = vmul.f32 %v3495_v1, %v1693_v5 }
 0x23a   : > { %v1873_v46 = vmax.f32 %v1841_v61, 0.0  ;;  %v1842_v55 = vadd.f32 %v3500_v53, %v1803_v12 }
 0x23b   : > { %v1871_v14 = vmax.f32 %v1839_v25, 0.0  ;;  %v1840_v54 = vadd.f32 %v3500_v53, %v1801_v52 }
 0x23c   : > { %1905 = vst [vmem:[%s3512_s10 + $0x50] sm:$0xff] %v1873_v46  ;;  %v1874_v40 = vmax.f32 %v1842_v55, 0.0 }
 0x23d   : > { %1903 = vst [vmem:[%s3512_s10 + $0x40] sm:$0xff] %v1871_v14  ;;  %v1872_v42 = vmax.f32 %v1840_v54, 0.0 }
 0x23e   : > { %1906 = vst [vmem:[%s3512_s10 + $0x58] sm:$0xff] %v1874_v40 }
 0x23f   : > { %1904 = vst [vmem:[%s3512_s10 + $0x48] sm:$0xff] %v1872_v42 }
 0x26a   : > { %v2163_v26 = vpop.f32.mrb[12].mxu1 }
 0x26b   : > { %v1822_v34 = vmul.f32 %v2163_v26, %v3495_v1  ;;  %v1770_v49 = vpop.f32.mrb[13].mxu1 }
 0x26c   : > { %v1820_v47 = vmul.f32 %v3495_v1, %v1770_v49  ;;  %v2164_v30 = vpop.f32.mrb[14].mxu1 }
 0x26d   : > { %v1861_v57 = vadd.f32 %v3500_v53, %v1822_v34  ;;  %v1823_v11 = vmul.f32 %v2164_v30, %v3495_v1  ;;  %v1773_v60 = vpop.f32.mrb[15].mxu1 }
 0x26e   : > { %v1859_v58 = vadd.f32 %v3500_v53, %v1820_v47  ;;  %v1821_v15 = vmul.f32 %v3495_v1, %v1773_v60 }
 0x26f   : > { %v1893_v4 = vmax.f32 %v1861_v57, 0.0  ;;  %v1862_v31 = vadd.f32 %v3500_v53, %v1823_v11 }
 0x270   : > { %v1891_v20 = vmax.f32 %v1859_v58, 0.0  ;;  %v1860_v35 = vadd.f32 %v3500_v53, %v1821_v15 }
 0x271   : > { %v2147_v48 = vpop.f32.mrb[12].mxu0  ;;  %1925 = vst [vmem:[%s3512_s10 + $0xf0] sm:$0xff] %v1893_v4  ;;  %v1894_v10 = vmax.f32 %v1862_v31, 0.0 }
 0x272   : > { %v1806_v23 = vmul.f32 %v2147_v48, %v3495_v1  ;;  %v1706_v16 = vpop.f32.mrb[13].mxu0  ;;  %1923 = vst [vmem:[%s3512_s10 + $0xe0] sm:$0xff] %v1891_v20  ;;  %v1892_v62 = vmax.f32 %v1860_v35, 0.0 }
 0x273   : > { %v1804_v50 = vmul.f32 %v3495_v1, %v1706_v16  ;;  %v2148_v39 = vpop.f32.mrb[14].mxu0  ;;  %1926 = vst [vmem:[%s3512_s10 + $0xf8] sm:$0xff] %v1894_v10 }
 0x274   : > { %v1845_v19 = vadd.f32 %v3500_v53, %v1806_v23  ;;  %v1807_v2 = vmul.f32 %v2148_v39, %v3495_v1  ;;  %v1709_v18 = vpop.f32.mrb[15].mxu0  ;;  %1924 = vst [vmem:[%s3512_s10 + $0xe8] sm:$0xff] %v1892_v62 }
 0x275   : > { %v1843_v27 = vadd.f32 %v3500_v53, %v1804_v50  ;;  %v1805_v6 = vmul.f32 %v3495_v1, %v1709_v18 }
 0x276   : > { %v1877_v36 = vmax.f32 %v1845_v19, 0.0  ;;  %v1846_v22 = vadd.f32 %v3500_v53, %v1807_v2 }
 0x277   : > { %v1875_v24 = vmax.f32 %v1843_v27, 0.0  ;;  %v1844_v43 = vadd.f32 %v3500_v53, %v1805_v6 }
 0x278   : > { %1909 = vst [vmem:[%s3512_s10 + $0x70] sm:$0xff] %v1877_v36  ;;  %v1878_v9 = vmax.f32 %v1846_v22, 0.0 }
 0x279   : > { %1907 = vst [vmem:[%s3512_s10 + $0x60] sm:$0xff] %v1875_v24  ;;  %v1876_v3 = vmax.f32 %v1844_v43, 0.0 }
 0x27a   : > { %1910 = vst [vmem:[%s3512_s10 + $0x78] sm:$0xff] %v1878_v9 }
 0x27b   : > { %1908 = vst [vmem:[%s3512_s10 + $0x68] sm:$0xff] %v1876_v3 }
 0x27c   : > { %2256 = shalt.err (!%p2253_p3)
}
 0x27d   : > { %s2257_s29 = scalar_lea.hbm %s3604_s20, 4096  ;;  %s2261_s6 = scalar_lea.hbm %s3659_s4, 8192 }
 0x27e   : > { %p2258_p4 = scmp.ne.s32.totalorder %s3604_s20, %s2257_s29  ;;  %p2262_p9 = scmp.lt.u32.totalorder %s3604_s20, %s3659_s4 }
 0x27f   : > { %p2263_p10 = scmp.lt.u32.totalorder %s2261_s6, %s2257_s29  ;;  %p2265_p12 = scmp.lt.u32.totalorder %s2257_s29, %s3604_s20 }
 0x280   : > { %p2259_p7 = pnand %p2258_p4, %p2380_p5 }
 0x281   : > { %p2264_p11 = por %p2263_p10, %p2262_p9 }
 0x282   : > { %p2260_p8 = pneg %p2259_p7 }
 0x283   : > { %p2266_p13 = por %p2265_p12, %p2264_p11 }
 0x285   : > { %p2267_p0 = pnand %p2266_p13, %p2260_p8 }
 0x287   : > { %2270 = shalt.err (!%p2267_p0)
}
 0x288   : > { %s2316_s10 = smov 128  }
 0x289   : > { %2174 = dma.vmem_to_hbm [thread:$0]  (%p2380_p5), %s3607_s12, 4096, %s3604_s20, %s3613_s19, %s2316_s10, %s2316_s10, %s2308_s7  }
 0x28a PF: > { %p2180_p1 = scmp.ge.s32.totalorder %s2305_s18, 2  ;;  %s1956_s11 = sand.u32 1, %s2293_s15  }
 0x28b   : > { %s1957_s13 = scalar_lea.sflag [#allocation3], %s1956_s11 }
 0x28c   : > { %p2177_p2 = pnand %p2180_p1, %p2384_p6 }
 0x28e   : > { %2288 = dma.done.wait (!%p2177_p2), %s1957_s13, 4096  }
 0x28f   : > { %2290 = vsyncadd (!%p2177_p2), %s1957_s13, 4294963200  ;;  %p14_p3 = scmp.ge.s32.totalorder %s2367_s21, 4   ;;  %s3687_s15 = smov %s2297_s16 }
 0x290   : > { %s3688_s16 = smov %s2301_s17  ;;  %s3689_s17 = smov %s2378_s24 }
 0x291   : > { %s3690_s18 = smov %s2367_s21  ;;  %16 = sbr.rel (!%p14_p3) target bundleno = 3 (0x3), region = 71 }
 0x298   :  { %1962 = vsyncpa [#allocation3], 1 }
 0x299   :  { %1964 = vsyncpa [#allocation3 + $0x1], 1 }

</bundles_post_ra>
